<compile_context>
chip_gen: v5e
topology: v5e:2x2
jax: 0.10.0
libtpu: 0.0.40
codegen_flags: <defaults>
</compile_context>

<pallas_src>
import functools

import numpy as np
import jax
import jax.numpy as jnp
from jax.experimental import pallas as pl
from jax.experimental.pallas import tpu as pltpu


# --------------------------------------------------------------------------- #
# helpers
# --------------------------------------------------------------------------- #
def _round_up(n, m):
    return ((n + m - 1) // m) * m


def _pad_to(arr, rows, cols):
    """Zero-pad a 2-D array to exactly (rows, cols)."""
    pr = rows - arr.shape[0]
    pc = cols - arr.shape[1]
    if pr == 0 and pc == 0:
        return arr
    return jnp.pad(arr, ((0, pr), (0, pc)))


def _choose_tile(n_padded, min_blocks=1):
    """Largest tile in (512, 384, 256, 128) dividing n_padded (a multiple of
    128) that leaves at least `min_blocks` blocks."""
    for t in (512, 384, 256, 128):
        if n_padded % t == 0 and n_padded // t >= min_blocks:
            return t
    return n_padded            # only hit when n_padded == 128 and min_blocks > 1


# H (layer-input activation) is held fully VMEM-resident when it is at most
# this many bytes — budgeted conservatively against v7x's 64 MiB physical /
# 32 MiB default-scoped VMEM (double-buffer-safe).  Otherwise H is streamed
# in (tk, F) blocks per K step.
_H_RESIDENT_BYTES = 10 * 1024 * 1024
_VMEM_LIMIT_BYTES = 48 * 1024 * 1024   # > default scoped limit, < v7x physical


# --------------------------------------------------------------------------- #
# fused GCN layer kernel:  out = act(A @ (H @ W) + b) [* dropout mask]
# grid = (row blocks i, K blocks k); K is the reduction axis (innermost,
# "arbitrary") with a float32 VMEM accumulator.
# --------------------------------------------------------------------------- #
def _gcn_layer_kernel(*refs, tk, h_resident, apply_relu, apply_dropout):
    if apply_dropout:
        a_ref, h_ref, w_ref, b_ref, m_ref, o_ref, acc_ref = refs
    else:
        a_ref, h_ref, w_ref, b_ref, o_ref, acc_ref = refs
        m_ref = None

    k = pl.program_id(1)

    @pl.when(k == 0)
    def _():
        acc_ref[...] = jnp.zeros_like(acc_ref)

    # Feature transform for this K block: (tk, F) @ (F, Hp) on the MXU.  W is
    # small and VMEM-resident; recomputing it per row block is free MXU filler
    # because the kernel is HBM-bound on A.
    if h_resident:
        h_blk = h_ref[pl.ds(k * tk, tk), :]
    else:
        h_blk = h_ref[...]
    xw = jnp.dot(h_blk, w_ref[...], preferred_element_type=jnp.float32)
    xw = xw.astype(jnp.bfloat16)

    # Propagation: bf16 x bf16 -> f32 accumulate on the MXU.
    acc_ref[...] += jnp.dot(a_ref[...], xw, preferred_element_type=jnp.float32)

    @pl.when(k == pl.num_programs(1) - 1)
    def _():
        # Bias / ReLU / dropout applied exactly once, at finalize.
        z = acc_ref[...] + b_ref[...]
        if apply_relu:
            z = jnp.maximum(z, 0.0)
        if apply_dropout:
            z = z * m_ref[...]                 # mask holds {0, 1/(1-p)}
        o_ref[...] = z.astype(o_ref.dtype)


def _gcn_layer(a_p, h_p, w_p, b_p, mask_p, *, apply_relu, out_dtype):
    n_p = a_p.shape[0]
    f_in = h_p.shape[1]
    h_out = w_p.shape[1]

    tm = _choose_tile(n_p, min_blocks=2)   # >= 2 row blocks keeps both TCs busy
    tk = _choose_tile(n_p, min_blocks=1)   # reduction axis: biggest tile wins
    h_resident = n_p * f_in * 2 <= _H_RESIDENT_BYTES
    apply_dropout = mask_p is not None

    in_specs = [pl.BlockSpec((tm, tk), lambda i, k: (i, k))]            # A block
    if h_resident:
        # Constant block index -> H is DMA'd once and stays VMEM-resident.
        in_specs.append(pl.BlockSpec((n_p, f_in), lambda i, k: (0, 0)))
    else:
        in_specs.append(pl.BlockSpec((tk, f_in), lambda i, k: (k, 0)))
    in_specs.append(pl.BlockSpec((f_in, h_out), lambda i, k: (0, 0)))   # W
    in_specs.append(pl.BlockSpec((1, h_out), lambda i, k: (0, 0)))      # bias

    args = [a_p, h_p, w_p, b_p]
    if apply_dropout:
        in_specs.append(pl.BlockSpec((tm, h_out), lambda i, k: (i, 0)))  # mask
        args.append(mask_p)

    kernel = functools.partial(
        _gcn_layer_kernel, tk=tk, h_resident=h_resident,
        apply_relu=bool(apply_relu), apply_dropout=apply_dropout)

    return pl.pallas_call(
        kernel,
        out_shape=jax.ShapeDtypeStruct((n_p, h_out), out_dtype),
        grid_spec=pltpu.PrefetchScalarGridSpec(
            num_scalar_prefetch=0,
            grid=(n_p // tm, n_p // tk),
            in_specs=in_specs,
            out_specs=pl.BlockSpec((tm, h_out), lambda i, k: (i, 0)),
            scratch_shapes=[pltpu.VMEM((tm, h_out), jnp.float32)],
        ),
        compiler_params=pltpu.CompilerParams(
            dimension_semantics=("parallel", "arbitrary"),
            vmem_limit_bytes=_VMEM_LIMIT_BYTES),
    )(*args)


# --------------------------------------------------------------------------- #
# full StandGCNX forward
# --------------------------------------------------------------------------- #
def _forward_impl(a_hat, x, weights, biases, rng, dropout_p, training):
    n = x.shape[0]
    nclass = weights[-1].shape[1]
    n_layers = len(weights)

    n_p = _round_up(n, 128)                 # pad node count to the tile grid
    f_p = _round_up(x.shape[1], 128)        # lane-dense feature dim

    # bf16 storage, f32 accumulation.  Padded rows/cols of A are zero, so the
    # padded node rows never contribute downstream.
    a_p = _pad_to(a_hat, n_p, n_p).astype(jnp.bfloat16)
    h = _pad_to(x, n_p, f_p).astype(jnp.bfloat16)

    for layer in range(n_layers):
        w, b = weights[layer], biases[layer]
        is_last = layer == n_layers - 1
        d_in_p = _round_up(w.shape[0], 128)
        d_out_p = _round_up(w.shape[1], 128)
        # Zero-padded weight rows/cols keep the padded feature columns exactly
        # zero through relu/dropout, so semantics are unchanged.
        w_p = _pad_to(w, d_in_p, d_out_p).astype(jnp.bfloat16)
        b_p = _pad_to(b.reshape(1, -1), 1, d_out_p).astype(jnp.float32)

        mask = None
        if (not is_last) and training and dropout_p > 0.0:
            # Dropout on the OUTPUT of this non-final layer == F.dropout on the
            # input of the next layer.  Mask built with jax.random (portable),
            # applied inside the kernel finalize.
            layer_key = jax.random.fold_in(rng, layer)
            keep = jax.random.bernoulli(layer_key, 1.0 - dropout_p,
                                        (n_p, d_out_p))
            mask = keep.astype(jnp.float32) * np.float32(1.0 / (1.0 - dropout_p))

        h = _gcn_layer(a_p, h, w_p, b_p, mask,
                       apply_relu=not is_last,
                       out_dtype=jnp.float32 if is_last else jnp.bfloat16)

    return h[:n, :nclass]                   # strip node + class padding


stand_gcnx_forward = jax.jit(_forward_impl,
                             static_argnames=("dropout_p", "training"))


# --------------------------------------------------------------------------- #
# reference + demo inputs
# --------------------------------------------------------------------------- #
def _reference_forward(a_hat, x, weights, biases):
    """Pure-JAX eval-mode reference with matching bf16-in / f32-acc numerics."""
    a = a_hat.astype(jnp.bfloat16)
    h = x.astype(jnp.bfloat16)
    n_layers = len(weights)
    for layer, (w, b) in enumerate(zip(weights, biases)):
        xw = jnp.dot(h, w.astype(jnp.bfloat16),
                     preferred_element_type=jnp.float32).astype(jnp.bfloat16)
        z = jnp.dot(a, xw, preferred_element_type=jnp.float32) \
            + b.astype(jnp.float32)
        if layer < n_layers - 1:
            h = jnp.maximum(z, 0.0).astype(jnp.bfloat16)
        else:
            h = z
    return h


def _build_normalized_adj(key, n_nodes, avg_degree=4):
    """Dense D^{-1/2}(A+I)D^{-1/2} from a random symmetric edge set."""
    # TODO(synk): the PyTorch module consumes a sparse edge_index; sparse
    # scatter/gather message passing is materialized here as a dense matmul.
    p = avg_degree / n_nodes
    upper = jax.random.bernoulli(key, p, (n_nodes, n_nodes)).astype(jnp.float32)
    a = jnp.triu(upper, 1)
    a = a + a.T + jnp.eye(n_nodes, dtype=jnp.float32)
    deg = jnp.sum(a, axis=1)
    d_inv_sqrt = 1.0 / jnp.sqrt(deg)
    return a * d_inv_sqrt[:, None] * d_inv_sqrt[None, :]


def _glorot(key, shape):
    limit = jnp.sqrt(6.0 / (shape[0] + shape[1]))
    return jax.random.uniform(key, shape, jnp.float32, -limit, limit)


if __name__ == "__main__":
    # Small shapes consistent with the module: N nodes, nfeat -> nhid -> nclass.
    N, NFEAT, NHID, NCLASS, NLAYER = 512, 96, 64, 16, 3
    DROPOUT = 0.5

    key = jax.random.PRNGKey(0)
    keys = jax.random.split(key, 2 + 2 * NLAYER)
    k_adj, k_x, k_params = keys[0], keys[1], keys[2:]

    a_hat = _build_normalized_adj(k_adj, N)
    x = jax.random.normal(k_x, (N, NFEAT), jnp.float32)

    dims = [NFEAT] + [NHID] * (NLAYER - 1) + [NCLASS]
    weights, biases = [], []
    for l in range(NLAYER):
        weights.append(_glorot(k_params[2 * l], (dims[l], dims[l + 1])))
        biases.append(0.1 * jax.random.normal(k_params[2 * l + 1],
                                              (dims[l + 1],), jnp.float32))
    weights, biases = tuple(weights), tuple(biases)
    rng = jax.random.PRNGKey(42)

    # Eval mode (deterministic; dropout is identity).
    out = stand_gcnx_forward(a_hat, x, weights, biases, rng,
                             dropout_p=DROPOUT, training=False)
    out = jax.block_until_ready(out)
    assert out.shape == (N, NCLASS)

    ref = jax.block_until_ready(_reference_forward(a_hat, x, weights, biases))
    max_err = float(jnp.max(jnp.abs(out - ref)))
    assert jnp.allclose(out, ref, atol=5e-2, rtol=5e-2), f"max_err={max_err}"

    # Training mode: exercises the fused dropout-mask path (stochastic).
    out_tr = stand_gcnx_forward(a_hat, x, weights, biases, rng,
                                dropout_p=DROPOUT, training=True)
    out_tr = jax.block_until_ready(out_tr)
    assert out_tr.shape == (N, NCLASS)
    assert bool(jnp.all(jnp.isfinite(out_tr)))

    print("KERNEL_OK")
</pallas_src>

<mosaic_0001>
module attributes {stable_mosaic.version = 11 : i64} {
  func.func @_gcn_layer_kernel(%arg0: i32, %arg1: i32, %arg2: memref<256x512xbf16, #tpu.memory_space<vmem>>, %arg3: memref<512x128xbf16, #tpu.memory_space<vmem>>, %arg4: memref<128x128xbf16, #tpu.memory_space<vmem>>, %arg5: memref<1x128xf32, #tpu.memory_space<vmem>>, %arg6: memref<256x128xbf16, #tpu.memory_space<vmem>>, %arg7: memref<256x128xf32, #tpu.memory_space<vmem>>) attributes {dimension_semantics = [#tpu.dimension_semantics<parallel>, #tpu.dimension_semantics<arbitrary>], iteration_bounds = array<i64: 2, 1>, scalar_prefetch = 0 : i64, scratch_operands = 1 : i64, tpu.core_type = #tpu.core_type<tc>, window_params = [{transform_indices = @transform_0, window_bounds = array<i64: 256, 512>}, {pipeline_mode = #tpu.pipeline_mode<synchronous>, transform_indices = @transform_1, window_bounds = array<i64: 512, 128>}, {pipeline_mode = #tpu.pipeline_mode<synchronous>, transform_indices = @transform_2, window_bounds = array<i64: 128, 128>}, {pipeline_mode = #tpu.pipeline_mode<synchronous>, transform_indices = @transform_3, window_bounds = array<i64: 1, 128>}, {transform_indices = @transform_4, window_bounds = array<i64: 256, 128>}]} {
    %c0_i32 = arith.constant 0 : i32
    %0 = arith.cmpi eq, %arg1, %c0_i32 : i32
    %1 = arith.extui %0 : i1 to i32
    %c0_i32_0 = arith.constant 0 : i32
    %2 = arith.cmpi ne, %1, %c0_i32_0 : i32
    scf.if %2 {
      %cst_12 = arith.constant 0.000000e+00 : f32
      %17 = vector.broadcast %cst_12 : f32 to vector<256x128xf32>
      %c0_13 = arith.constant 0 : index
      %c0_14 = arith.constant 0 : index
      %18 = vector.load %arg7[%c0_13, %c0_14] : memref<256x128xf32, #tpu.memory_space<vmem>>, vector<256x128xf32>
      tpu.vector_store %arg7[%c0_13, %c0_14], %17 {strides = array<i32>} : memref<256x128xf32, #tpu.memory_space<vmem>>, vector<256x128xf32>,
    } else {
    }
    %c512_i32 = arith.constant 512 : i32
    %3 = arith.muli %arg1, %c512_i32 : i32
    %4 = arith.index_cast %3 : i32 to index
    %c0 = arith.constant 0 : index
    %5 = vector.load %arg3[%4, %c0] : memref<512x128xbf16, #tpu.memory_space<vmem>>, vector<512x128xbf16>
    %c0_1 = arith.constant 0 : index
    %c0_2 = arith.constant 0 : index
    %6 = vector.load %arg4[%c0_1, %c0_2] : memref<128x128xbf16, #tpu.memory_space<vmem>>, vector<128x128xbf16>
    %cst = arith.constant dense<0.000000e+00> : vector<512x128xf32>
    %7 = tpu.matmul %5, %6, %cst {dimension_numbers = #tpu.dot_dimension_numbers<[1], [0], [0], [1], [0, 0, 1, 1], [], []>} : vector<512x128xbf16>, vector<128x128xbf16>, vector<512x128xf32> -> vector<512x128xf32>
    %8 = arith.truncf %7 : vector<512x128xf32> to vector<512x128xbf16>
    %c0_3 = arith.constant 0 : index
    %c0_4 = arith.constant 0 : index
    %9 = vector.load %arg7[%c0_3, %c0_4] : memref<256x128xf32, #tpu.memory_space<vmem>>, vector<256x128xf32>
    %c0_5 = arith.constant 0 : index
    %c0_6 = arith.constant 0 : index
    %10 = vector.load %arg2[%c0_5, %c0_6] : memref<256x512xbf16, #tpu.memory_space<vmem>>, vector<256x512xbf16>
    %cst_7 = arith.constant dense<0.000000e+00> : vector<256x128xf32>
    %11 = tpu.matmul %10, %8, %cst_7 {dimension_numbers = #tpu.dot_dimension_numbers<[1], [0], [0], [1], [0, 0, 1, 1], [], []>} : vector<256x512xbf16>, vector<512x128xbf16>, vector<256x128xf32> -> vector<256x128xf32>
    %12 = arith.addf %9, %11 : vector<256x128xf32>
    %c0_8 = arith.constant 0 : index
    %c0_9 = arith.constant 0 : index
    %13 = vector.load %arg7[%c0_8, %c0_9] : memref<256x128xf32, #tpu.memory_space<vmem>>, vector<256x128xf32>
    tpu.vector_store %arg7[%c0_8, %c0_9], %12 {strides = array<i32>} : memref<256x128xf32, #tpu.memory_space<vmem>>, vector<256x128xf32>,
    %c0_i32_10 = arith.constant 0 : i32
    %14 = arith.cmpi eq, %arg1, %c0_i32_10 : i32
    %15 = arith.extui %14 : i1 to i32
    %c0_i32_11 = arith.constant 0 : i32
    %16 = arith.cmpi ne, %15, %c0_i32_11 : i32
    scf.if %16 {
      %c0_12 = arith.constant 0 : index
      %c0_13 = arith.constant 0 : index
      %17 = vector.load %arg7[%c0_12, %c0_13] : memref<256x128xf32, #tpu.memory_space<vmem>>, vector<256x128xf32>
      %c0_14 = arith.constant 0 : index
      %c0_15 = arith.constant 0 : index
      %18 = vector.load %arg5[%c0_14, %c0_15] : memref<1x128xf32, #tpu.memory_space<vmem>>, vector<1x128xf32>
      %19 = vector.broadcast %18 : vector<1x128xf32> to vector<256x128xf32>
      %20 = arith.addf %17, %19 : vector<256x128xf32>
      %cst_16 = arith.constant 0.000000e+00 : f32
      %21 = vector.broadcast %cst_16 : f32 to vector<256x128xf32>
      %22 = arith.maximumf %20, %21 : vector<256x128xf32>
      %23 = arith.truncf %22 : vector<256x128xf32> to vector<256x128xbf16>
      %c0_17 = arith.constant 0 : index
      %c0_18 = arith.constant 0 : index
      %24 = vector.load %arg6[%c0_17, %c0_18] : memref<256x128xbf16, #tpu.memory_space<vmem>>, vector<256x128xbf16>
      tpu.vector_store %arg6[%c0_17, %c0_18], %23 {strides = array<i32>} : memref<256x128xbf16, #tpu.memory_space<vmem>>, vector<256x128xbf16>,
    } else {
    }
    return
  }
  func.func @transform_0(%arg0: i32, %arg1: i32) -> (i32, i32) {
    %c0_i32 = arith.constant 0 : i32
    return %arg0, %arg1 : i32, i32
  }
  func.func @transform_1(%arg0: i32, %arg1: i32) -> (i32, i32) {
    %c0_i32 = arith.constant 0 : i32
    %c0_i32_0 = arith.constant 0 : i32
    %c0_i32_1 = arith.constant 0 : i32
    return %c0_i32, %c0_i32_0 : i32, i32
  }
  func.func @transform_2(%arg0: i32, %arg1: i32) -> (i32, i32) {
    %c0_i32 = arith.constant 0 : i32
    %c0_i32_0 = arith.constant 0 : i32
    %c0_i32_1 = arith.constant 0 : i32
    return %c0_i32, %c0_i32_0 : i32, i32
  }
  func.func @transform_3(%arg0: i32, %arg1: i32) -> (i32, i32) {
    %c0_i32 = arith.constant 0 : i32
    %c0_i32_0 = arith.constant 0 : i32
    %c0_i32_1 = arith.constant 0 : i32
    return %c0_i32, %c0_i32_0 : i32, i32
  }
  func.func @transform_4(%arg0: i32, %arg1: i32) -> (i32, i32) {
    %c0_i32 = arith.constant 0 : i32
    %c0_i32_0 = arith.constant 0 : i32
    return %arg0, %c0_i32 : i32, i32
  }
}

module attributes {stable_mosaic.version = 11 : i64} {
  func.func @_gcn_layer_kernel(%arg0: i32, %arg1: i32, %arg2: memref<256x512xbf16, #tpu.memory_space<vmem>>, %arg3: memref<512x128xbf16, #tpu.memory_space<vmem>>, %arg4: memref<128x128xbf16, #tpu.memory_space<vmem>>, %arg5: memref<1x128xf32, #tpu.memory_space<vmem>>, %arg6: memref<256x128xf32, #tpu.memory_space<vmem>>, %arg7: memref<256x128xf32, #tpu.memory_space<vmem>>) attributes {dimension_semantics = [#tpu.dimension_semantics<parallel>, #tpu.dimension_semantics<arbitrary>], iteration_bounds = array<i64: 2, 1>, scalar_prefetch = 0 : i64, scratch_operands = 1 : i64, tpu.core_type = #tpu.core_type<tc>, window_params = [{transform_indices = @transform_0, window_bounds = array<i64: 256, 512>}, {pipeline_mode = #tpu.pipeline_mode<synchronous>, transform_indices = @transform_1, window_bounds = array<i64: 512, 128>}, {pipeline_mode = #tpu.pipeline_mode<synchronous>, transform_indices = @transform_2, window_bounds = array<i64: 128, 128>}, {pipeline_mode = #tpu.pipeline_mode<synchronous>, transform_indices = @transform_3, window_bounds = array<i64: 1, 128>}, {transform_indices = @transform_4, window_bounds = array<i64: 256, 128>}]} {
    %c0_i32 = arith.constant 0 : i32
    %0 = arith.cmpi eq, %arg1, %c0_i32 : i32
    %1 = arith.extui %0 : i1 to i32
    %c0_i32_0 = arith.constant 0 : i32
    %2 = arith.cmpi ne, %1, %c0_i32_0 : i32
    scf.if %2 {
      %cst_12 = arith.constant 0.000000e+00 : f32
      %17 = vector.broadcast %cst_12 : f32 to vector<256x128xf32>
      %c0_13 = arith.constant 0 : index
      %c0_14 = arith.constant 0 : index
      %18 = vector.load %arg7[%c0_13, %c0_14] : memref<256x128xf32, #tpu.memory_space<vmem>>, vector<256x128xf32>
      tpu.vector_store %arg7[%c0_13, %c0_14], %17 {strides = array<i32>} : memref<256x128xf32, #tpu.memory_space<vmem>>, vector<256x128xf32>,
    } else {
    }
    %c512_i32 = arith.constant 512 : i32
    %3 = arith.muli %arg1, %c512_i32 : i32
    %4 = arith.index_cast %3 : i32 to index
    %c0 = arith.constant 0 : index
    %5 = vector.load %arg3[%4, %c0] : memref<512x128xbf16, #tpu.memory_space<vmem>>, vector<512x128xbf16>
    %c0_1 = arith.constant 0 : index
    %c0_2 = arith.constant 0 : index
    %6 = vector.load %arg4[%c0_1, %c0_2] : memref<128x128xbf16, #tpu.memory_space<vmem>>, vector<128x128xbf16>
    %cst = arith.constant dense<0.000000e+00> : vector<512x128xf32>
    %7 = tpu.matmul %5, %6, %cst {dimension_numbers = #tpu.dot_dimension_numbers<[1], [0], [0], [1], [0, 0, 1, 1], [], []>} : vector<512x128xbf16>, vector<128x128xbf16>, vector<512x128xf32> -> vector<512x128xf32>
    %8 = arith.truncf %7 : vector<512x128xf32> to vector<512x128xbf16>
    %c0_3 = arith.constant 0 : index
    %c0_4 = arith.constant 0 : index
    %9 = vector.load %arg7[%c0_3, %c0_4] : memref<256x128xf32, #tpu.memory_space<vmem>>, vector<256x128xf32>
    %c0_5 = arith.constant 0 : index
    %c0_6 = arith.constant 0 : index
    %10 = vector.load %arg2[%c0_5, %c0_6] : memref<256x512xbf16, #tpu.memory_space<vmem>>, vector<256x512xbf16>
    %cst_7 = arith.constant dense<0.000000e+00> : vector<256x128xf32>
    %11 = tpu.matmul %10, %8, %cst_7 {dimension_numbers = #tpu.dot_dimension_numbers<[1], [0], [0], [1], [0, 0, 1, 1], [], []>} : vector<256x512xbf16>, vector<512x128xbf16>, vector<256x128xf32> -> vector<256x128xf32>
    %12 = arith.addf %9, %11 : vector<256x128xf32>
    %c0_8 = arith.constant 0 : index
    %c0_9 = arith.constant 0 : index
    %13 = vector.load %arg7[%c0_8, %c0_9] : memref<256x128xf32, #tpu.memory_space<vmem>>, vector<256x128xf32>
    tpu.vector_store %arg7[%c0_8, %c0_9], %12 {strides = array<i32>} : memref<256x128xf32, #tpu.memory_space<vmem>>, vector<256x128xf32>,
    %c0_i32_10 = arith.constant 0 : i32
    %14 = arith.cmpi eq, %arg1, %c0_i32_10 : i32
    %15 = arith.extui %14 : i1 to i32
    %c0_i32_11 = arith.constant 0 : i32
    %16 = arith.cmpi ne, %15, %c0_i32_11 : i32
    scf.if %16 {
      %c0_12 = arith.constant 0 : index
      %c0_13 = arith.constant 0 : index
      %17 = vector.load %arg7[%c0_12, %c0_13] : memref<256x128xf32, #tpu.memory_space<vmem>>, vector<256x128xf32>
      %c0_14 = arith.constant 0 : index
      %c0_15 = arith.constant 0 : index
      %18 = vector.load %arg5[%c0_14, %c0_15] : memref<1x128xf32, #tpu.memory_space<vmem>>, vector<1x128xf32>
      %19 = vector.broadcast %18 : vector<1x128xf32> to vector<256x128xf32>
      %20 = arith.addf %17, %19 : vector<256x128xf32>
      %c0_16 = arith.constant 0 : index
      %c0_17 = arith.constant 0 : index
      %21 = vector.load %arg6[%c0_16, %c0_17] : memref<256x128xf32, #tpu.memory_space<vmem>>, vector<256x128xf32>
      tpu.vector_store %arg6[%c0_16, %c0_17], %20 {strides = array<i32>} : memref<256x128xf32, #tpu.memory_space<vmem>>, vector<256x128xf32>,
    } else {
    }
    return
  }
  func.func @transform_0(%arg0: i32, %arg1: i32) -> (i32, i32) {
    %c0_i32 = arith.constant 0 : i32
    return %arg0, %arg1 : i32, i32
  }
  func.func @transform_1(%arg0: i32, %arg1: i32) -> (i32, i32) {
    %c0_i32 = arith.constant 0 : i32
    %c0_i32_0 = arith.constant 0 : i32
    %c0_i32_1 = arith.constant 0 : i32
    return %c0_i32, %c0_i32_0 : i32, i32
  }
  func.func @transform_2(%arg0: i32, %arg1: i32) -> (i32, i32) {
    %c0_i32 = arith.constant 0 : i32
    %c0_i32_0 = arith.constant 0 : i32
    %c0_i32_1 = arith.constant 0 : i32
    return %c0_i32, %c0_i32_0 : i32, i32
  }
  func.func @transform_3(%arg0: i32, %arg1: i32) -> (i32, i32) {
    %c0_i32 = arith.constant 0 : i32
    %c0_i32_0 = arith.constant 0 : i32
    %c0_i32_1 = arith.constant 0 : i32
    return %c0_i32, %c0_i32_0 : i32, i32
  }
  func.func @transform_4(%arg0: i32, %arg1: i32) -> (i32, i32) {
    %c0_i32 = arith.constant 0 : i32
    %c0_i32_0 = arith.constant 0 : i32
    return %arg0, %c0_i32 : i32, i32
  }
}

</mosaic_0001>

<bundles_post_ra>
// kernel: _forward_impl.3
= control target key start
LH: loop header
LB: loop body
LE: loop exit
PB: predicated region body
PF: predicated region fallthrough
CT: control target
= control target key end

     0   :  { %s2588_s15 = smov 0   ;;  %s2590_s16 = smov 0   ;;  %s3157_s0 = inlined_call_operand.vmem [shape: bf16[512,512], index: 0, kind: input, shape index: {}]   ;;  %s3158_s1 = inlined_call_operand.vmem [shape: bf16[512,128], index: 1, kind: input, shape index: {}]   ;;  %s3159_s2 = inlined_call_operand.vmem [shape: bf16[128,128], index: 2, kind: input, shape index: {}]   ;;  %s3160_s3 = inlined_call_operand.vmem [shape: f32[1,128], index: 3, kind: input, shape index: {}]   ;;  %s3161_s4 = inlined_call_operand.vmem [shape: bf16[512,128], index: 4, kind: output, shape index: {}]  }
   0x1   :  { %s2592_s17 = smov 0  }
   0x2 LB: > { %s26_s18 = sadd.s32 1, %s2557_s16  ;;  %p1874_p0 = scmp.ge.s32.totalorder %s2561_s17, 1  ;;  %s2561_s17 = sphi %s2592_s17, %s14_s17   ;;  %s2557_s16 = sphi %s2590_s16, %s3163_s16   ;;  %s2553_s15 = sphi %s2588_s15, %s3162_s15  }
   0x3   : > { %p28_p1 = scmp.ge.s32.totalorder %s26_s18, 2  ;;  %p183_p2 = scmp.lt.s32.totalorder %s2561_s17, 3 }
   0x5   : > { %s3165_s18 = smov (%p28_p1, %s26_s18), 0  ;;  %p184_p3 = pnand %p1874_p0, %p183_p2 }
   0x6   : > { %s1875_s5 = sshll.u32 (!%p184_p3), %s2553_s15, 5 }
   0x7   : > { %187 = sbr.rel (%p184_p3) target bundleno = 970 (0x3ca), region = 36  ;;  %p216_p4 = scmp.lt.s32.totalorder (!%p184_p3), %s1875_s5, 63 }
   0xc   : > { %v2338_v0 = vld [vmem:[%s3159_s2 + $0x38] sm:$0xff]  ;;  %v2337_v1 = vld [vmem:[%s3159_s2 + $0x30] sm:$0xff]  ;;  %v2336_v2 = vld [vmem:[%s3159_s2 + $0x28] sm:$0xff]  ;;  %s3167_s5 = smov (!%p216_p4, %s1875_s5), 63 }
   0xd   : > { %593 = vmatpush.bf16.msra.mxu0 %v2338_v0  ;;  %2498 = vmatpush.bf16.msra.mxu2 %v2338_v0  ;;  %v2335_v3 = vld [vmem:[%s3159_s2 + $0x20] sm:$0xff]  ;;  %v2334_v4 = vld [vmem:[%s3159_s2 + $0x18] sm:$0xff]  ;;  %v2333_v5 = vld [vmem:[%s3159_s2 + $0x10] sm:$0xff]  ;;  %s2298_s15 = sshll.u32 %s3167_s5, 4  ;;  %s1879_s13 = sshll.u32 %s3167_s5, 2 }
   0xe   : > { %v2332_v6 = vld [vmem:[%s3159_s2 + $0x8] sm:$0xff]  ;;  %v2331_v7 = vld [vmem:[%s3159_s2] sm:$0xff]  ;;  %v2301_v10 = vld [vmem:[%s3158_s1 + $0x10] sm:$0xff]  ;;  %s2782_s8 = scalar_lea.vmem %s3157_s0, %s2298_s15  ;;  %s3027_s20 = scalar_lea.vmem %s3161_s4, %s1879_s13 }
   0xf   : > { %v2299_v8 = vld [vmem:[%s3158_s1] sm:$0xff]  ;;  %v2300_v9 = vld [vmem:[%s3158_s1 + $0x8] sm:$0xff]  ;;  %v2302_v11 = vld [vmem:[%s3158_s1 + $0x18] sm:$0xff] }
  0x10   : > { %v2303_v12 = vld [vmem:[%s3158_s1 + $0x20] sm:$0xff]  ;;  %v2304_v14 = vld [vmem:[%s3158_s1 + $0x28] sm:$0xff]  ;;  %v2305_v15 = vld [vmem:[%s3158_s1 + $0x30] sm:$0xff] }
  0x11   : > { %594 = vmatpush.bf16.msra.mxu0 %v2337_v1  ;;  %2499 = vmatpush.bf16.msra.mxu2 %v2337_v1  ;;  %v2323_v13 = vld [vmem:[%s3158_s1 + $0xc0] sm:$0xff]  ;;  %v2324_v16 = vld [vmem:[%s3158_s1 + $0xc8] sm:$0xff]  ;;  %v2306_v17 = vld [vmem:[%s3158_s1 + $0x38] sm:$0xff] }
  0x12   : > { %v2325_v18 = vld [vmem:[%s3158_s1 + $0xd0] sm:$0xff]  ;;  %v2307_v19 = vld [vmem:[%s3158_s1 + $0x40] sm:$0xff]  ;;  %v2326_v20 = vld [vmem:[%s3158_s1 + $0xd8] sm:$0xff] }
  0x13   : > { %v2308_v24 = vld [vmem:[%s3158_s1 + $0x48] sm:$0xff]  ;;  %v2327_v25 = vld [vmem:[%s3158_s1 + $0xe0] sm:$0xff]  ;;  %v2309_v29 = vld [vmem:[%s3158_s1 + $0x50] sm:$0xff] }
  0x14   : > { %v2328_v30 = vld [vmem:[%s3158_s1 + $0xe8] sm:$0xff]  ;;  %v2310_v34 = vld [vmem:[%s3158_s1 + $0x58] sm:$0xff]  ;;  %v2329_v35 = vld [vmem:[%s3158_s1 + $0xf0] sm:$0xff] }
  0x15   : > { %595 = vmatpush.bf16.msra.mxu0 %v2336_v2  ;;  %2500 = vmatpush.bf16.msra.mxu2 %v2336_v2  ;;  %v2311_v39 = vld [vmem:[%s3158_s1 + $0x60] sm:$0xff]  ;;  %v2330_v40 = vld [vmem:[%s3158_s1 + $0xf8] sm:$0xff]  ;;  %v2312_v43 = vld [vmem:[%s3158_s1 + $0x68] sm:$0xff] }
  0x16   : > { %v2313_v48 = vld [vmem:[%s3158_s1 + $0x70] sm:$0xff]  ;;  %v2314_v53 = vld [vmem:[%s3158_s1 + $0x78] sm:$0xff]  ;;  %v2315_v60 = vld [vmem:[%s3158_s1 + $0x80] sm:$0xff] }
  0x19   : > { %596 = vmatpush.bf16.msra.mxu0 %v2335_v3  ;;  %2501 = vmatpush.bf16.msra.mxu2 %v2335_v3 }
  0x1d   : > { %597 = vmatpush.bf16.msra.mxu0 %v2334_v4  ;;  %2502 = vmatpush.bf16.msra.mxu2 %v2334_v4  ;;  %v2316_v4 = vld [vmem:[%s3158_s1 + $0x88] sm:$0xff] }
  0x21   : > { %598 = vmatpush.bf16.msra.mxu0 %v2333_v5  ;;  %2503 = vmatpush.bf16.msra.mxu2 %v2333_v5 }
  0x25   : > { %599 = vmatpush.bf16.msra.mxu0 %v2332_v6  ;;  %2504 = vmatpush.bf16.msra.mxu2 %v2332_v6 }
  0x29   : > { %600 = vmatpush.bf16.msra.mxu0 %v2331_v7  ;;  %2505 = vmatpush.bf16.msra.mxu2 %v2331_v7 }
  0x2c   : > { %601 = vmatmul.bf16.vlgmr.msra.gmra.mxu0 %v2299_v8  ;;  %721 = vmatmul.bf16.vlgmr.msra.gmra.mxu2 %v2323_v13 }
  0x3c   : > { %606 = vmatmul.bf16.gmra.mxu0 %v2300_v9  ;;  %726 = vmatmul.bf16.gmra.mxu2 %v2324_v16  ;;  %v2318_v16 = vld [vmem:[%s3158_s1 + $0x98] sm:$0xff] }
  0x4c   : > { %611 = vmatmul.bf16.gmra.mxu0 %v2301_v10  ;;  %731 = vmatmul.bf16.gmra.mxu2 %v2325_v18  ;;  %v2317_v10 = vld [vmem:[%s3158_s1 + $0x90] sm:$0xff] }
  0x5c   : > { %616 = vmatmul.bf16.gmra.mxu0 %v2302_v11  ;;  %736 = vmatmul.bf16.gmra.mxu2 %v2326_v20 }
  0x6c   : > { %621 = vmatmul.bf16.gmra.mxu0 %v2303_v12  ;;  %741 = vmatmul.bf16.gmra.mxu2 %v2327_v25 }
  0x7c   : > { %626 = vmatmul.bf16.gmra.mxu0 %v2304_v14  ;;  %746 = vmatmul.bf16.gmra.mxu2 %v2328_v30 }
  0x8c   : > { %631 = vmatmul.bf16.gmra.mxu0 %v2305_v15  ;;  %751 = vmatmul.bf16.gmra.mxu2 %v2329_v35  ;;  %v2321_v35 = vld [vmem:[%s3158_s1 + $0xb0] sm:$0xff] }
  0x9c   : > { %636 = vmatmul.bf16.gmra.mxu0 %v2306_v17  ;;  %756 = vmatmul.bf16.gmra.mxu2 %v2330_v40 }
  0xa9   : > { %v602_v21 = vpop.f32.mrf.mxu0 }
  0xac   : > { %641 = vmatmul.bf16.gmra.mxu0 %v2307_v19 }
  0xaf   : > { %v2702_v45 = vpop.f32.mrf.mxu2 }
  0xb1   : > { %v604_v22 = vpop.f32.mrf.mxu0 }
  0xb2   : > { %v2671_v23 = vpack.c.bf16 %v604_v22, %v602_v21  ;;  %v2319_v22 = vld [vmem:[%s3158_s1 + $0xa0] sm:$0xff] }
  0xb7   : > { %v2704_v47 = vpop.f32.mrf.mxu2 }
  0xb8   : > { %v786_v40 = vpack.c.bf16 %v2704_v47, %v2702_v45  ;;  %v2042_v47 = vld [vmem:[%s2782_s8] sm:$0xf] }
  0xb9   : > { %v607_v26 = vpop.f32.mrf.mxu0 }
  0xbc   : > { %646 = vmatmul.bf16.gmra.mxu0 %v2308_v24 }
  0xbf   : > { %v2709_v50 = vpop.f32.mrf.mxu2 }
  0xc1   : > { %v609_v27 = vpop.f32.mrf.mxu0 }
  0xc2   : > { %v2679_v28 = vpack.c.bf16 %v609_v27, %v607_v26 }
  0xc7   : > { %v2711_v52 = vpop.f32.mrf.mxu2 }
  0xc9   : > { %v612_v31 = vpop.f32.mrf.mxu0 }
  0xcc   : > { %651 = vmatmul.bf16.gmra.mxu0 %v2309_v29 }
  0xcf   : > { %v2716_v55 = vpop.f32.mrf.mxu2 }
  0xd1   : > { %v614_v32 = vpop.f32.mrf.mxu0 }
  0xd2   : > { %v764_v33 = vpack.c.bf16 %v614_v32, %v612_v31 }
  0xd7   : > { %v2718_v58 = vpop.f32.mrf.mxu2 }
  0xd9   : > { %v617_v36 = vpop.f32.mrf.mxu0 }
  0xdc   : > { %656 = vmatmul.bf16.gmra.mxu0 %v2310_v34 }
  0xdf   : > { %v737_v63 = vpop.f32.mrf.mxu2 }
  0xe1   : > { %v619_v37 = vpop.f32.mrf.mxu0 }
  0xe2   : > { %v765_v38 = vpack.c.bf16 %v619_v37, %v617_v36  ;;  %v788_v37 = vpack.c.bf16 %v2718_v58, %v2716_v55 }
  0xe7   : > { %v739_v3 = vpop.f32.mrf.mxu2 }
  0xe8   : > { %v789_v34 = vpack.c.bf16 %v739_v3, %v737_v63  ;;  %v2202_v3 = vld [vmem:[%s2782_s8 + $0x140] sm:$0xf] }
  0xe9   : > { %v622_v41 = vpop.f32.mrf.mxu0 }
  0xec   : > { %661 = vmatmul.bf16.gmra.mxu0 %v2311_v39 }
  0xef   : > { %v742_v6 = vpop.f32.mrf.mxu2 }
  0xf1   : > { %v624_v42 = vpop.f32.mrf.mxu0 }
  0xf2   : > { %v766_v0 = vpack.c.bf16 %v624_v42, %v622_v41  ;;  %v2322_v41 = vld [vmem:[%s3158_s1 + $0xb8] sm:$0xff] }
  0xf7   : > { %v744_v9 = vpop.f32.mrf.mxu2 }
  0xf9   : > { %v627_v44 = vpop.f32.mrf.mxu0 }
  0xfc   : > { %666 = vmatmul.bf16.gmra.mxu0 %v2312_v43  ;;  %v2170_v43 = vld [vmem:[%s2782_s8 + $0x100] sm:$0xf] }
  0xff   : > { %v747_v12 = vpop.f32.mrf.mxu2 }
 0x101   : > { %v629_v46 = vpop.f32.mrf.mxu0 }
 0x102   : > { %v767_v62 = vpack.c.bf16 %v629_v46, %v627_v44  ;;  %v2373_v44 = vld [vmem:[%s2782_s8 + $0x10c] sm:$0xf0] }
 0x103   : > { %v2171_v45 = vor.u32 %v2373_v44, %v2170_v43  ;;  %v2122_v43 = vld [vmem:[%s2782_s8 + $0xa0] sm:$0xf]  ;;  %v2361_v44 = vld [vmem:[%s2782_s8 + $0xac] sm:$0xf0] }
 0x107   : > { %v749_v15 = vpop.f32.mrf.mxu2 }
 0x108   : > { %v791_v31 = vpack.c.bf16 %v749_v15, %v747_v12  ;;  %v2218_v15 = vld [vmem:[%s2782_s8 + $0x160] sm:$0xf] }
 0x109   : > { %v632_v49 = vpop.f32.mrf.mxu0 }
 0x10c   : > { %671 = vmatmul.bf16.gmra.mxu0 %v2313_v48 }
 0x10f   : > { %v752_v18 = vpop.f32.mrf.mxu2 }
 0x111   : > { %v634_v51 = vpop.f32.mrf.mxu0 }
 0x112   : > { %v768_v59 = vpack.c.bf16 %v634_v51, %v632_v49  ;;  %v2341_v49 = vld [vmem:[%s2782_s8 + $0xc] sm:$0xf0] }
 0x117   : > { %v754_v21 = vpop.f32.mrf.mxu2 }
 0x118   : > { %v792_v30 = vpack.c.bf16 %v754_v21, %v752_v18  ;;  %v2353_v21 = vld [vmem:[%s2782_s8 + $0x6c] sm:$0xf0] }
 0x119   : > { %v637_v54 = vpop.f32.mrf.mxu0 }
 0x11c   : > { %676 = vmatmul.bf16.gmra.mxu0 %v2314_v53  ;;  %v2186_v53 = vld [vmem:[%s2782_s8 + $0x120] sm:$0xf] }
 0x11f   : > { %v757_v24 = vpop.f32.mrf.mxu2 }
 0x121   : > { %v639_v56 = vpop.f32.mrf.mxu0 }
 0x122   : > { %v769_v57 = vpack.c.bf16 %v639_v56, %v637_v54  ;;  %v2377_v54 = vld [vmem:[%s2782_s8 + $0x12c] sm:$0xf0] }
 0x123   : > { %v2187_v56 = vor.u32 %v2377_v54, %v2186_v53 }
 0x124   : > { %1210 = vmatpush.bf16.msra.mxu1 %v769_v57  ;;  %2506 = vmatpush.bf16.msra.mxu3 %v769_v57 }
 0x127   : > { %v759_v26 = vpop.f32.mrf.mxu2 }
 0x128   : > { %1211 = vmatpush.bf16.msra.mxu1 %v768_v59  ;;  %2507 = vmatpush.bf16.msra.mxu3 %v768_v59  ;;  %v793_v27 = vpack.c.bf16 %v759_v26, %v757_v24  ;;  %v2058_v59 = vld [vmem:[%s2782_s8 + $0x20] sm:$0xf] }
 0x129   : > { %v2723_v61 = vpop.f32.mrf.mxu0  ;;  %v2234_v24 = vld [vmem:[%s2782_s8 + $0x180] sm:$0xf] }
 0x12c   : > { %681 = vmatmul.bf16.gmra.mxu0 %v2315_v60  ;;  %1212 = vmatpush.bf16.msra.mxu1 %v767_v62 }
 0x12d   : > { %2508 = vmatpush.bf16.msra.mxu3 %v767_v62  ;;  %v2345_v62 = vld [vmem:[%s2782_s8 + $0x2c] sm:$0xf0] }
 0x12e   : > { %v2059_v63 = vor.u32 %v2345_v62, %v2058_v59  ;;  %v2282_v62 = vld [vmem:[%s2782_s8 + $0x1e0] sm:$0xf] }
 0x130   : > { %1213 = vmatpush.bf16.msra.mxu1 %v766_v0 }
 0x131   : > { %2509 = vmatpush.bf16.msra.mxu3 %v766_v0  ;;  %v2725_v1 = vpop.f32.mrf.mxu0 }
 0x132   : > { %v770_v2 = vpack.c.bf16 %v2725_v1, %v2723_v61  ;;  %v2343_v1 = vld [vmem:[%s2782_s8 + $0x24] sm:$0xf] }
 0x134   : > { %1214 = vmatpush.bf16.msra.mxu1 %v765_v38 }
 0x135   : > { %2510 = vmatpush.bf16.msra.mxu3 %v765_v38  ;;  %v787_v38 = vpack.c.bf16 %v2711_v52, %v2709_v50  ;;  %v2043_v50 = vor.u32 %v2341_v49, %v2042_v47  ;;  %v2266_v47 = vld [vmem:[%s2782_s8 + $0x1c0] sm:$0xf] }
 0x138   : > { %1215 = vmatpush.bf16.msra.mxu1 %v764_v33 }
 0x139   : > { %2511 = vmatpush.bf16.msra.mxu3 %v764_v33  ;;  %v2732_v5 = vpop.f32.mrf.mxu0  ;;  %v790_v33 = vpack.c.bf16 %v744_v9, %v742_v6  ;;  %v2339_v9 = vld [vmem:[%s2782_s8 + $0x4] sm:$0xf] }
 0x13c   : > { %686 = vmatmul.bf16.gmra.mxu0 %v2316_v4  ;;  %1216 = vmatpush.bf16.msra.mxu1 %v2679_v28  ;;  %v2381_v4 = vld [vmem:[%s2782_s8 + $0x14c] sm:$0xf0] }
 0x13d   : > { %2512 = vmatpush.bf16.msra.mxu3 %v2679_v28  ;;  %v2320_v28 = vld [vmem:[%s3158_s1 + $0xa8] sm:$0xff]  ;;  %v2203_v6 = vor.u32 %v2381_v4, %v2202_v3  ;;  %v2359_v4 = vld [vmem:[%s2782_s8 + $0xa4] sm:$0xf] }
 0x140   : > { %1217 = vmatpush.bf16.msra.mxu1 %v2671_v23 }
 0x141   : > { %2513 = vmatpush.bf16.msra.mxu3 %v2671_v23  ;;  %v2738_v7 = vpop.f32.mrf.mxu0 }
 0x142   : > { %v771_v8 = vpack.c.bf16 %v2738_v7, %v2732_v5  ;;  %v2349_v5 = vld [vmem:[%s2782_s8 + $0x4c] sm:$0xf0] }
 0x143   : > { %1218 = vmatmul.bf16.vlgmr.msra.gmra.mxu1 %v2043_v50  ;;  %v2355_v50 = vld [vmem:[%s2782_s8 + $0x84] sm:$0xf] }
 0x144   : > { %1477 = vmatpush.bf16.msrb.mxu1 %v793_v27  ;;  %1258 = vmatmul.bf16.vlgmr.msra.gmra.mxu3 %v2171_v45  ;;  %v2347_v27 = vld [vmem:[%s2782_s8 + $0x44] sm:$0xf]  ;;  %v2123_v45 = vor.u32 %v2361_v44, %v2122_v43  ;;  %v2342_v43 = vld [vmem:[%s2782_s8 + $0x14] sm:$0xf0] }
 0x148   : > { %1478 = vmatpush.bf16.msrb.mxu1 %v792_v30 }
 0x149   : > { %v2745_v11 = vpop.f32.mrf.mxu0 }
 0x14c   : > { %691 = vmatmul.bf16.gmra.mxu0 %v2317_v10  ;;  %1479 = vmatpush.bf16.msrb.mxu1 %v791_v31  ;;  %v2044_v10 = vld [vmem:[%s2782_s8 + $0x10] sm:$0xf0]  ;;  %v2106_v31 = vld [vmem:[%s2782_s8 + $0x80] sm:$0xf] }
 0x14d   : > { %v2047_v12 = vor.u32 %v2339_v9, %v2044_v10 }
 0x150   : > { %1480 = vmatpush.bf16.msrb.mxu1 %v790_v33  ;;  %v2357_v33 = vld [vmem:[%s2782_s8 + $0x8c] sm:$0xf0] }
 0x151   : > { %v2747_v13 = vpop.f32.mrf.mxu0 }
 0x152   : > { %v772_v14 = vpack.c.bf16 %v2747_v13, %v2745_v11  ;;  %v2074_v13 = vld [vmem:[%s2782_s8 + $0x40] sm:$0xf] }
 0x153   : > { %1223 = vmatmul.bf16.gmra.mxu1 %v2059_v63  ;;  %v2075_v7 = vor.u32 %v2349_v5, %v2074_v13  ;;  %v2401_v63 = vld [vmem:[%s2782_s8 + $0x1ec] sm:$0xf0] }
 0x154   : > { %1481 = vmatpush.bf16.msrb.mxu1 %v789_v34  ;;  %1263 = vmatmul.bf16.gmra.mxu3 %v2187_v56  ;;  %v2107_v34 = vor.u32 %v2357_v33, %v2106_v31  ;;  %v2365_v56 = vld [vmem:[%s2782_s8 + $0xcc] sm:$0xf0]  ;;  %v2283_v3 = vor.u32 %v2401_v63, %v2282_v62 }
 0x155   : > { %v2369_v13 = vld [vmem:[%s2782_s8 + $0xec] sm:$0xf0] }
 0x158   : > { %1482 = vmatpush.bf16.msrb.mxu1 %v788_v37  ;;  %v2393_v37 = vld [vmem:[%s2782_s8 + $0x1ac] sm:$0xf0] }
 0x159   : > { %v2754_v17 = vpop.f32.mrf.mxu0 }
 0x15c   : > { %696 = vmatmul.bf16.gmra.mxu0 %v2318_v16  ;;  %1483 = vmatpush.bf16.msrb.mxu1 %v787_v38  ;;  %v2385_v16 = vld [vmem:[%s2782_s8 + $0x16c] sm:$0xf0] }
 0x15d   : > { %v2219_v61 = vor.u32 %v2385_v16, %v2218_v15  ;;  %v2363_v15 = vld [vmem:[%s2782_s8 + $0xc4] sm:$0xf]  ;;  %v2140_v16 = vld [vmem:[%s2782_s8 + $0xd0] sm:$0xf0] }
 0x160   : > { %1484 = vmatpush.bf16.msrb.mxu1 %v786_v40  ;;  %v2092_v40 = vld [vmem:[%s2782_s8 + $0x70] sm:$0xf0] }
 0x161   : > { %v2756_v19 = vpop.f32.mrf.mxu0 }
 0x162   : > { %v773_v20 = vpack.c.bf16 %v2756_v19, %v2754_v17  ;;  %v2090_v19 = vld [vmem:[%s2782_s8 + $0x60] sm:$0xf] }
 0x163   : > { %1228 = vmatmul.bf16.gmra.mxu1 %v2075_v7 }
 0x164   : > { %1268 = vmatmul.bf16.gmra.mxu3 %v2203_v6  ;;  %v2124_v6 = vld [vmem:[%s2782_s8 + $0xb0] sm:$0xf0] }
 0x165   : > { %v2127_v9 = vor.u32 %v2359_v4, %v2124_v6  ;;  %v2204_v4 = vld [vmem:[%s2782_s8 + $0x150] sm:$0xf0]  ;;  %v2082_v6 = vld [vmem:[%s2782_s8 + $0x48] sm:$0xf] }
 0x169   : > { %v662_v23 = vpop.f32.mrf.mxu0 }
 0x16c   : > { %701 = vmatmul.bf16.gmra.mxu0 %v2319_v22  ;;  %v2091_v22 = vor.u32 %v2353_v21, %v2090_v19  ;;  %v2052_v21 = vld [vmem:[%s2782_s8 + $0x18] sm:$0xf0] }
 0x171   : > { %v664_v25 = vpop.f32.mrf.mxu0 }
 0x172   : > { %v774_v57 = vpack.c.bf16 %v664_v25, %v662_v23  ;;  %v2389_v25 = vld [vmem:[%s2782_s8 + $0x18c] sm:$0xf0] }
 0x173   : > { %1233 = vmatmul.bf16.gmra.mxu1 %v2091_v22  ;;  %v2235_v26 = vor.u32 %v2389_v25, %v2234_v24 }
 0x174   : > { %1273 = vmatmul.bf16.gmra.mxu3 %v2219_v61  ;;  %v2143_v61 = vor.u32 %v2363_v15, %v2140_v16  ;;  %v2116_v16 = vld [vmem:[%s2782_s8 + $0x98] sm:$0xf0] }
 0x179   : > { %v667_v29 = vpop.f32.mrf.mxu0 }
 0x17c   : > { %706 = vmatmul.bf16.gmra.mxu0 %v2320_v28  ;;  %v2076_v28 = vld [vmem:[%s2782_s8 + $0x50] sm:$0xf0] }
 0x181   : > { %v669_v32 = vpop.f32.mrf.mxu0 }
 0x182   : > { %v775_v55 = vpack.c.bf16 %v669_v32, %v667_v29  ;;  %v2079_v29 = vor.u32 %v2347_v27, %v2076_v28  ;;  %v2367_v28 = vld [vmem:[%s2782_s8 + $0xe4] sm:$0xf] }
 0x183   : > { %1238 = vmatmul.bf16.gmra.mxu1 %v2107_v34  ;;  %v2344_v34 = vld [vmem:[%s2782_s8 + $0x2c] sm:$0xf] }
 0x184   : > { %1278 = vmatmul.bf16.gmra.mxu3 %v2235_v26 }
 0x189   : > { %v672_v36 = vpop.f32.mrf.mxu0 }
 0x18c   : > { %711 = vmatmul.bf16.gmra.mxu0 %v2321_v35 }
 0x191   : > { %v674_v39 = vpop.f32.mrf.mxu0 }
 0x192   : > { %v776_v51 = vpack.c.bf16 %v674_v39, %v672_v36  ;;  %v2250_v36 = vld [vmem:[%s2782_s8 + $0x1a0] sm:$0xf]  ;;  %v2351_v39 = vld [vmem:[%s2782_s8 + $0x64] sm:$0xf] }
 0x193   : > { %v2251_v38 = vor.u32 %v2393_v37, %v2250_v36  ;;  %1243 = vmatmul.bf16.gmra.mxu1 %v2123_v45 }
 0x195   : > { %1283 = vmatmul.bf16.gmra.mxu3 %v2251_v38  ;;  %v2068_v38 = vld [vmem:[%s2782_s8 + $0x38] sm:$0xf0] }
 0x199   : > { %v677_v42 = vpop.f32.mrf.mxu0 }
 0x19c   : > { %716 = vmatmul.bf16.gmra.mxu0 %v2322_v41  ;;  %v2095_v41 = vor.u32 %v2351_v39, %v2092_v40  ;;  %v2071_v39 = vor.u32 %v2344_v34, %v2068_v38  ;;  %v2371_v40 = vld [vmem:[%s2782_s8 + $0x104] sm:$0xf]  ;;  %v2360_v34 = vld [vmem:[%s2782_s8 + $0xac] sm:$0xf]  ;;  %v2132_v38 = vld [vmem:[%s2782_s8 + $0xb8] sm:$0xf0] }
 0x1a1   : > { %v679_v46 = vpop.f32.mrf.mxu0 }
 0x1a2   : > { %v777_v48 = vpack.c.bf16 %v679_v46, %v677_v42 }
 0x1a4   : > { %1299 = vmatpush.bf16.msrb.mxu2 %v777_v48  ;;  %v2397_v48 = vld [vmem:[%s2782_s8 + $0x1cc] sm:$0xf0] }
 0x1a5   : > { %v2267_v49 = vor.u32 %v2397_v48, %v2266_v47  ;;  %v2188_v47 = vld [vmem:[%s2782_s8 + $0x130] sm:$0xf0] }
 0x1a7   : > { %1288 = vmatmul.bf16.gmra.mxu3 %v2267_v49 }
 0x1a8   : > { %1300 = vmatpush.bf16.msrb.mxu2 %v776_v51  ;;  %v2108_v51 = vld [vmem:[%s2782_s8 + $0x90] sm:$0xf0] }
 0x1a9   : > { %v2791_v52 = vpop.f32.mrf.mxu0  ;;  %v2111_v53 = vor.u32 %v2355_v50, %v2108_v51 }
 0x1ac   : > { %1301 = vmatpush.bf16.msrb.mxu2 %v775_v55  ;;  %v2138_v55 = vld [vmem:[%s2782_s8 + $0xc0] sm:$0xf] }
 0x1b0   : > { %1302 = vmatpush.bf16.msrb.mxu2 %v774_v57  ;;  %v2139_v57 = vor.u32 %v2365_v56, %v2138_v55  ;;  %v2100_v55 = vld [vmem:[%s2782_s8 + $0x78] sm:$0xf0] }
 0x1b1   : > { %v2795_v58 = vpop.f32.mrf.mxu0 }
 0x1b2   : > { %v778_v60 = vpack.c.bf16 %v2795_v58, %v2791_v52  ;;  %1248 = vmatmul.bf16.gmra.mxu1 %v2139_v57  ;;  %v2066_v52 = vld [vmem:[%s2782_s8 + $0x28] sm:$0xf]  ;;  %v2346_v58 = vld [vmem:[%s2782_s8 + $0x34] sm:$0xf0] }
 0x1b3   : > { %v2067_v50 = vor.u32 %v2346_v58, %v2066_v52  ;;  %v2148_v52 = vld [vmem:[%s2782_s8 + $0xd8] sm:$0xf0] }
 0x1b4   : > { %1303 = vmatpush.bf16.msrb.mxu2 %v773_v20 }
 0x1b7   : > { %1293 = vmatmul.bf16.gmra.mxu3 %v2283_v3  ;;  %v2379_v3 = vld [vmem:[%s2782_s8 + $0x144] sm:$0xf] }
 0x1b8   : > { %1304 = vmatpush.bf16.msrb.mxu2 %v772_v14 }
 0x1b9   : > { %v2807_v0 = vpop.f32.mrf.mxu0 }
 0x1bc   : > { %1305 = vmatpush.bf16.msrb.mxu2 %v771_v8 }
 0x1c0   : > { %1306 = vmatpush.bf16.msrb.mxu2 %v770_v2  ;;  %v2060_v2 = vld [vmem:[%s2782_s8 + $0x30] sm:$0xf0]  ;;  %v1219_v19 = vpop.f32.mrf.mxu1 }
 0x1c1   : > { %v2819_v11 = vpop.f32.mrf.mxu0  ;;  %v2063_v17 = vor.u32 %v2343_v1, %v2060_v2  ;;  %v2340_v2 = vld [vmem:[%s2782_s8 + $0xc] sm:$0xf] }
 0x1c2   : > { %v779_v14 = vpack.c.bf16 %v2819_v11, %v2807_v0  ;;  %v2055_v22 = vor.u32 %v2340_v2, %v2052_v21  ;;  %v2383_v21 = vld [vmem:[%s2782_s8 + $0x164] sm:$0xf] }
 0x1c3   : > { %1307 = vmatmul.bf16.vlgmr.msrb.gmra.mxu2 %v2047_v12  ;;  %v2154_v12 = vld [vmem:[%s2782_s8 + $0xe0] sm:$0xf] }
 0x1c4   : > { %v2155_v5 = vor.u32 %v2369_v13, %v2154_v12  ;;  %v2207_v13 = vor.u32 %v2379_v3, %v2204_v4  ;;  %v2164_v4 = vld [vmem:[%s2782_s8 + $0xf8] sm:$0xf0] }
 0x1c6   : > { %1253 = vmatmul.bf16.gmra.mxu1 %v2155_v5 }
 0x1c7   : > { %v2873_v25 = vpop.f32.mrf.mxu3 }
 0x1c8   : > { %v1221_v27 = vpop.f32.mrf.mxu1 }
 0x1c9   : > { %v2825_v8 = vpop.f32.mrf.mxu0 }
 0x1cf   : > { %v2879_v36 = vpop.f32.mrf.mxu3 }
 0x1d0   : > { %v1224_v37 = vpop.f32.mrf.mxu1 }
 0x1d1   : > { %v2831_v18 = vpop.f32.mrf.mxu0 }
 0x1d2   : > { %v780_v20 = vpack.c.bf16 %v2831_v18, %v2825_v8  ;;  %v2348_v8 = vld [vmem:[%s2782_s8 + $0x4c] sm:$0xf] }
 0x1d3   : > { %1312 = vmatmul.bf16.gmra.mxu2 %v2063_v17 }
 0x1d6   : > { %1485 = vmatmul.bf16.vlgmr.msrb.gmra.mxu1 %v2055_v22  ;;  %v2220_v22 = vld [vmem:[%s2782_s8 + $0x170] sm:$0xf0] }
 0x1d7   : > { %v2895_v44 = vpop.f32.mrf.mxu3 }
 0x1d9   : > { %v2837_v23 = vpop.f32.mrf.mxu0 }
 0x1e1   : > { %v2843_v30 = vpop.f32.mrf.mxu0 }
 0x1e2   : > { %v781_v32 = vpack.c.bf16 %v2843_v30, %v2837_v23 }
 0x1e3   : > { %1317 = vmatmul.bf16.gmra.mxu2 %v2079_v29  ;;  %v2156_v29 = vld [vmem:[%s2782_s8 + $0xf0] sm:$0xf0] }
 0x1e4   : > { %v2159_v33 = vor.u32 %v2367_v28, %v2156_v29 }
 0x1e6   : > { %1490 = vmatmul.bf16.gmra.mxu1 %v2071_v39  ;;  %v2135_v39 = vor.u32 %v2360_v34, %v2132_v38  ;;  %v2399_v34 = vld [vmem:[%s2782_s8 + $0x1e4] sm:$0xf]  ;;  %v2284_v38 = vld [vmem:[%s2782_s8 + $0x1f0] sm:$0xf0] }
 0x1e9   : > { %v2849_v35 = vpop.f32.mrf.mxu0 }
 0x1f1   : > { %v704_v42 = vpop.f32.mrf.mxu0 }
 0x1f2   : > { %v782_v31 = vpack.c.bf16 %v704_v42, %v2849_v35  ;;  %v1226_v35 = vpop.f32.mrf.mxu1  ;;  %v2050_v42 = vld [vmem:[%s2782_s8 + $0x8] sm:$0xf] }
 0x1f3   : > { %1322 = vmatmul.bf16.gmra.mxu2 %v2095_v41  ;;  %v2172_v41 = vld [vmem:[%s2782_s8 + $0x110] sm:$0xf0]  ;;  %v2051_v30 = vor.u32 %v2342_v43, %v2050_v42  ;;  %v2387_v43 = vld [vmem:[%s2782_s8 + $0x184] sm:$0xf] }
 0x1f4   : > { %v2175_v23 = vor.u32 %v2371_v40, %v2172_v41 }
 0x1f9   : > { %v707_v46 = vpop.f32.mrf.mxu0 }
 0x1fa   : > { %v1229_v18 = vpop.f32.mrf.mxu1 }
 0x201   : > { %v709_v54 = vpop.f32.mrf.mxu0 }
 0x202   : > { %v783_v26 = vpack.c.bf16 %v709_v54, %v707_v46  ;;  %v1231_v45 = vpop.f32.mrf.mxu1  ;;  %v2375_v46 = vld [vmem:[%s2782_s8 + $0x124] sm:$0xf] }
 0x203   : > { %1327 = vmatmul.bf16.gmra.mxu2 %v2111_v53  ;;  %v2191_v49 = vor.u32 %v2375_v46, %v2188_v47  ;;  %v2352_v53 = vld [vmem:[%s2782_s8 + $0x6c] sm:$0xf] }
 0x204   : > { %v2103_v56 = vor.u32 %v2352_v53, %v2100_v55  ;;  %v2130_v53 = vld [vmem:[%s2782_s8 + $0xa8] sm:$0xf] }
 0x209   : > { %v712_v59 = vpop.f32.mrf.mxu0 }
 0x20a   : > { %v1234_v54 = vpop.f32.mrf.mxu1 }
 0x211   : > { %v714_v10 = vpop.f32.mrf.mxu0 }
 0x212   : > { %v784_v24 = vpack.c.bf16 %v714_v10, %v712_v59  ;;  %v1236_v63 = vpop.f32.mrf.mxu1 }
 0x213   : > { %1332 = vmatmul.bf16.gmra.mxu2 %v2127_v9  ;;  %v2350_v9 = vld [vmem:[%s2782_s8 + $0x54] sm:$0xf0] }
 0x214   : > { %v2083_v5 = vor.u32 %v2350_v9, %v2082_v6 }
 0x219   : > { %v717_v7 = vpop.f32.mrf.mxu0 }
 0x21a   : > { %v2927_v15 = vpop.f32.mrf.mxu1 }
 0x221   : > { %v719_v1 = vpop.f32.mrf.mxu0 }
 0x222   : > { %v785_v17 = vpack.c.bf16 %v719_v1, %v717_v7  ;;  %v2356_v7 = vld [vmem:[%s2782_s8 + $0x8c] sm:$0xf] }
 0x223   : > { %1337 = vmatmul.bf16.gmra.mxu2 %v2143_v61  ;;  %v2119_v61 = vor.u32 %v2356_v7, %v2116_v16  ;;  %v2146_v7 = vld [vmem:[%s2782_s8 + $0xc8] sm:$0xf]  ;;  %v2366_v16 = vld [vmem:[%s2782_s8 + $0xd4] sm:$0xf0] }
 0x224   : > { %1388 = vmatpush.bf16.msrb.mxu3 %v785_v17 }
 0x228   : > { %1389 = vmatpush.bf16.msrb.mxu3 %v784_v24  ;;  %v2098_v24 = vld [vmem:[%s2782_s8 + $0x68] sm:$0xf] }
 0x22c   : > { %1390 = vmatpush.bf16.msrb.mxu3 %v783_v26  ;;  %v2354_v26 = vld [vmem:[%s2782_s8 + $0x74] sm:$0xf0] }
 0x230   : > { %1391 = vmatpush.bf16.msrb.mxu3 %v782_v31  ;;  %v2223_v31 = vor.u32 %v2383_v21, %v2220_v22  ;;  %v2372_v22 = vld [vmem:[%s2782_s8 + $0x10c] sm:$0xf] }
 0x233   : > { %1342 = vmatmul.bf16.gmra.mxu2 %v2159_v33  ;;  %v2099_v33 = vor.u32 %v2354_v26, %v2098_v24  ;;  %v2180_v24 = vld [vmem:[%s2782_s8 + $0x118] sm:$0xf0] }
 0x234   : > { %1392 = vmatpush.bf16.msrb.mxu3 %v781_v32 }
 0x238   : > { %1393 = vmatpush.bf16.msrb.mxu3 %v780_v20  ;;  %v2084_v20 = vld [vmem:[%s2782_s8 + $0x58] sm:$0xf0] }
 0x239   : > { %v2087_v0 = vor.u32 %v2348_v8, %v2084_v20  ;;  %v2358_v8 = vld [vmem:[%s2782_s8 + $0x94] sm:$0xf0] }
 0x23b   : > { %1495 = vmatmul.bf16.gmra.mxu1 %v2087_v0 }
 0x23c   : > { %1394 = vmatpush.bf16.msrb.mxu3 %v779_v14  ;;  %v2902_v14 = vpop.f32.mrf.mxu3 }
 0x240   : > { %1395 = vmatpush.bf16.msrb.mxu3 %v778_v60 }
 0x243   : > { %1347 = vmatmul.bf16.gmra.mxu2 %v2175_v23  ;;  %1396 = vmatmul.bf16.vlgmr.msrb.gmra.mxu3 %v2051_v30  ;;  %v2236_v23 = vld [vmem:[%s2782_s8 + $0x190] sm:$0xf0]  ;;  %v2114_v30 = vld [vmem:[%s2782_s8 + $0x88] sm:$0xf] }
 0x244   : > { %v2912_v51 = vpop.f32.mrf.mxu3  ;;  %v2239_v0 = vor.u32 %v2387_v43, %v2236_v23  ;;  %v2287_v43 = vor.u32 %v2399_v34, %v2284_v38  ;;  %v2384_v34 = vld [vmem:[%s2782_s8 + $0x16c] sm:$0xf] }
 0x246   : > { %v1308_v11 = vpop.f32.mrf.mxu2 }
 0x247   : > { %v2904_v32 = vadd.f32 %v1308_v11, %v1219_v19  ;;  %v2934_v19 = vpop.f32.mrf.mxu1  ;;  %v2115_v11 = vor.u32 %v2358_v8, %v2114_v30  ;;  %v2376_v30 = vld [vmem:[%s2782_s8 + $0x12c] sm:$0xf] }
 0x24b   : > { %1500 = vmatmul.bf16.gmra.mxu1 %v2103_v56 }
 0x24c   : > { %v2918_v62 = vpop.f32.mrf.mxu3 }
 0x24e   : > { %v1310_v60 = vpop.f32.mrf.mxu2 }
 0x24f   : > { %v2910_v48 = vadd.f32 %v1310_v60, %v1221_v27 }
 0x253   : > { %1352 = vmatmul.bf16.gmra.mxu2 %v2191_v49  ;;  %1401 = vmatmul.bf16.gmra.mxu3 %v2067_v50  ;;  %v2391_v49 = vld [vmem:[%s2782_s8 + $0x1a4] sm:$0xf]  ;;  %v2252_v50 = vld [vmem:[%s2782_s8 + $0x1b0] sm:$0xf0] }
 0x254   : > { %v2930_v1 = vpop.f32.mrf.mxu3  ;;  %v2255_v56 = vor.u32 %v2391_v49, %v2252_v50 }
 0x256   : > { %v1313_v57 = vpop.f32.mrf.mxu2 }
 0x257   : > { %v2916_v59 = vadd.f32 %v1313_v57, %v1224_v37  ;;  %v2945_v37 = vpop.f32.mrf.mxu1 }
 0x25b   : > { %1505 = vmatmul.bf16.gmra.mxu1 %v2119_v61 }
 0x25c   : > { %v2940_v28 = vpop.f32.mrf.mxu3 }
 0x25e   : > { %v1315_v10 = vpop.f32.mrf.mxu2 }
 0x25f   : > { %v2924_v12 = vadd.f32 %v1315_v10, %v1226_v35  ;;  %v2952_v42 = vpop.f32.mrf.mxu1 }
 0x263   : > { %1357 = vmatmul.bf16.gmra.mxu2 %v2207_v13  ;;  %1406 = vmatmul.bf16.gmra.mxu3 %v2083_v5  ;;  %v2395_v13 = vld [vmem:[%s2782_s8 + $0x1c4] sm:$0xf]  ;;  %v2268_v5 = vld [vmem:[%s2782_s8 + $0x1d0] sm:$0xf0] }
 0x264   : > { %v2950_v41 = vpop.f32.mrf.mxu3  ;;  %v2271_v61 = vor.u32 %v2395_v13, %v2268_v5  ;;  %v2194_v13 = vld [vmem:[%s2782_s8 + $0x128] sm:$0xf]  ;;  %v2378_v5 = vld [vmem:[%s2782_s8 + $0x134] sm:$0xf0] }
 0x266   : > { %v1318_v2 = vpop.f32.mrf.mxu2 }
 0x267   : > { %v2932_v17 = vadd.f32 %v1318_v2, %v1229_v18  ;;  %v2963_v47 = vpop.f32.mrf.mxu1  ;;  %v2147_v2 = vor.u32 %v2366_v16, %v2146_v7  ;;  %v3012_v16 = vld [vmem:[%s3160_s3] ss:$0 sm:$0xff] }
 0x26b   : > { %1510 = vmatmul.bf16.gmra.mxu1 %v2135_v39  ;;  %v2162_v39 = vld [vmem:[%s2782_s8 + $0xe8] sm:$0xf] }
 0x26c   : > { %v2961_v46 = vpop.f32.mrf.mxu3 }
 0x26e   : > { %v1320_v27 = vpop.f32.mrf.mxu2 }
 0x26f   : > { %v2942_v29 = vadd.f32 %v1320_v27, %v1231_v45  ;;  %v2364_v45 = vld [vmem:[%s2782_s8 + $0xcc] sm:$0xf]  ;;  %v2966_v60 = vpop.f32.mrf.mxu1  ;;  %v2183_v27 = vor.u32 %v2372_v22, %v2180_v24  ;;  %v2195_v22 = vor.u32 %v2378_v5, %v2194_v13 }
 0x270   : > { %v2151_v58 = vor.u32 %v2364_v45, %v2148_v52  ;;  %v2178_v52 = vld [vmem:[%s2782_s8 + $0x108] sm:$0xf]  ;;  %v2388_v13 = vld [vmem:[%s2782_s8 + $0x18c] sm:$0xf] }
 0x273   : > { %1362 = vmatmul.bf16.gmra.mxu2 %v2223_v31  ;;  %1411 = vmatmul.bf16.gmra.mxu3 %v2099_v33 }
 0x274   : > { %v2972_v55 = vpop.f32.mrf.mxu3 }
 0x276   : > { %v1323_v35 = vpop.f32.mrf.mxu2 }
 0x277   : > { %v2948_v40 = vadd.f32 %v1323_v35, %v1234_v54  ;;  %v2362_v54 = vld [vmem:[%s2782_s8 + $0xb4] sm:$0xf0]  ;;  %v2975_v3 = vpop.f32.mrf.mxu1 }
 0x278   : > { %v2131_v57 = vor.u32 %v2362_v54, %v2130_v53  ;;  %v2370_v35 = vld [vmem:[%s2782_s8 + $0xf4] sm:$0xf0]  ;;  %v2380_v53 = vld [vmem:[%s2782_s8 + $0x14c] sm:$0xf] }
 0x279   : > { %v2163_v23 = vor.u32 %v2370_v35, %v2162_v39 }
 0x27b   : > { %1515 = vmatmul.bf16.gmra.mxu1 %v2151_v58  ;;  %v2374_v58 = vld [vmem:[%s2782_s8 + $0x114] sm:$0xf0] }
 0x27c   : > { %v2978_v9 = vpop.f32.mrf.mxu3  ;;  %v2179_v50 = vor.u32 %v2374_v58, %v2178_v52  ;;  %v2382_v52 = vld [vmem:[%s2782_s8 + $0x154] sm:$0xf0] }
 0x27e   : > { %v1325_v18 = vpop.f32.mrf.mxu2 }
 0x27f   : > { %v2958_v20 = vadd.f32 %v1325_v18, %v1236_v63  ;;  %v2368_v63 = vld [vmem:[%s2782_s8 + $0xec] sm:$0xf]  ;;  %v2980_v10 = vpop.f32.mrf.mxu1  ;;  %v2196_v18 = vld [vmem:[%s2782_s8 + $0x138] sm:$0xf0] }
 0x280   : > { %v2167_v6 = vor.u32 %v2368_v63, %v2164_v4 }
 0x283   : > { %1367 = vmatmul.bf16.gmra.mxu2 %v2239_v0  ;;  %1416 = vmatmul.bf16.gmra.mxu3 %v2115_v11  ;;  %v2199_v0 = vor.u32 %v2376_v30, %v2196_v18 }
 0x284   : > { %v2986_v21 = vpop.f32.mrf.mxu3 }
 0x286   : > { %v3022_v35 = vpop.f32.mrf.mxu2 }
 0x287   : > { %v1486_v26 = vpop.f32.mrf.mxu1 }
 0x28b   : > { %1520 = vmatmul.bf16.gmra.mxu1 %v2167_v6 }
 0x28c   : > { %v2990_v31 = vpop.f32.mrf.mxu3 }
 0x28f   : > { %v1488_v33 = vpop.f32.mrf.mxu1 }
 0x293   : > { %1372 = vmatmul.bf16.gmra.mxu2 %v2255_v56  ;;  %1421 = vmatmul.bf16.gmra.mxu3 %v2131_v57  ;;  %v2212_v56 = vld [vmem:[%s2782_s8 + $0x158] sm:$0xf0] }
 0x294   : > { %v2998_v11 = vpop.f32.mrf.mxu3  ;;  %v2215_v57 = vor.u32 %v2380_v53, %v2212_v56 }
 0x297   : > { %v1491_v8 = vpop.f32.mrf.mxu1 }
 0x29b   : > { %1525 = vmatmul.bf16.gmra.mxu1 %v2183_v27 }
 0x29c   : > { %v3002_v49 = vpop.f32.mrf.mxu3 }
 0x29f   : > { %v1493_v45 = vpop.f32.mrf.mxu1 }
 0x2a3   : > { %1377 = vmatmul.bf16.gmra.mxu2 %v2271_v61  ;;  %1426 = vmatmul.bf16.gmra.mxu3 %v2147_v2 }
 0x2ab   : > { %1530 = vmatmul.bf16.gmra.mxu1 %v2199_v0  ;;  %v2210_v0 = vld [vmem:[%s2782_s8 + $0x148] sm:$0xf] }
 0x2b3   : > { %1382 = vmatmul.bf16.gmra.mxu2 %v2287_v43  ;;  %1431 = vmatmul.bf16.gmra.mxu3 %v2163_v23 }
 0x2b8   : > { %v1496_v54 = vpop.f32.mrf.mxu1 }
 0x2bb   : > { %1535 = vmatmul.bf16.gmra.mxu1 %v2215_v57  ;;  %v2211_v57 = vor.u32 %v2382_v52, %v2210_v0 }
 0x2c0   : > { %v1498_v6 = vpop.f32.mrf.mxu1 }
 0x2c3   : > { %1436 = vmatmul.bf16.gmra.mxu3 %v2179_v50  ;;  %v3033_v50 = vpop.f32.mrf.mxu2 }
 0x2c6   : > { %v1397_v63 = vpop.f32.mrf.mxu3 }
 0x2c7   : > { %v1398_v4 = vadd.f32 %v1397_v63, %v2904_v32  ;;  %v2228_v32 = vld [vmem:[%s2782_s8 + $0x178] sm:$0xf0] }
 0x2c8   : > { %v3017_v38 = vpop.f32.mrf.mxu1  ;;  %v2231_v39 = vor.u32 %v2384_v34, %v2228_v32  ;;  %v2226_v34 = vld [vmem:[%s2782_s8 + $0x168] sm:$0xf]  ;;  %v2386_v32 = vld [vmem:[%s2782_s8 + $0x174] sm:$0xf0] }
 0x2c9   : > { %v1487_v7 = vadd.f32 %v1486_v26, %v1398_v4 }
 0x2cb   : > { %v1669_v24 = vadd.f32 %v3012_v16, %v1487_v7  ;;  %1540 = vmatmul.bf16.gmra.mxu1 %v2231_v39 }
 0x2cd   : > { %v1701_v43 = vmax.f32 %v1669_v24, 0.0  ;;  %v3042_v24 = vpop.f32.mrf.mxu2 }
 0x2ce   : > { %v1399_v61 = vpop.f32.mrf.mxu3 }
 0x2cf   : > { %v1400_v2 = vadd.f32 %v1399_v61, %v2910_v48 }
 0x2d0   : > { %v1503_v18 = vpop.f32.mrf.mxu1 }
 0x2d1   : > { %v1489_v27 = vadd.f32 %v1488_v33, %v1400_v2 }
 0x2d3   : > { %v1670_v26 = vadd.f32 %v3012_v16, %v1489_v27  ;;  %1441 = vmatmul.bf16.gmra.mxu3 %v2195_v22 }
 0x2d5   : > { %v1702_v23 = vmax.f32 %v1670_v26, 0.0  ;;  %v3051_v0 = vpop.f32.mrf.mxu2 }
 0x2d6   : > { %v1402_v48 = vpop.f32.mrf.mxu3 }
 0x2d7   : > { %v2406_v33 = vpack.c.bf16 %v1702_v23, %v1701_v43  ;;  %v1403_v30 = vadd.f32 %v1402_v48, %v2916_v59  ;;  %v2244_v59 = vld [vmem:[%s2782_s8 + $0x198] sm:$0xf0]  ;;  %v2227_v23 = vor.u32 %v2386_v32, %v2226_v34 }
 0x2d8   : > { %v3038_v5 = vpop.f32.mrf.mxu1 }
 0x2d9   : > { %2407 = vst [vmem:[%s3027_s20] sm:$0xff] %v2406_v33   ;;  %v1492_v58 = vadd.f32 %v1491_v8, %v1403_v30  ;;  %v2247_v8 = vor.u32 %v2388_v13, %v2244_v59  ;;  %v2392_v30 = vld [vmem:[%s2782_s8 + $0x1ac] sm:$0xf]  ;;  %v2242_v13 = vld [vmem:[%s2782_s8 + $0x188] sm:$0xf]  ;;  %v2390_v59 = vld [vmem:[%s2782_s8 + $0x194] sm:$0xf0] }
 0x2db   : > { %v1671_v63 = vadd.f32 %v3012_v16, %v1492_v58  ;;  %1545 = vmatmul.bf16.gmra.mxu1 %v2247_v8 }
 0x2dd   : > { %v1703_v61 = vmax.f32 %v1671_v63, 0.0 }
 0x2de   : > { %v1404_v53 = vpop.f32.mrf.mxu3 }
 0x2df   : > { %v1405_v56 = vadd.f32 %v1404_v53, %v2924_v12 }
 0x2e0   : > { %v1508_v27 = vpop.f32.mrf.mxu1 }
 0x2e1   : > { %v1494_v4 = vadd.f32 %v1493_v45, %v1405_v56 }
 0x2e3   : > { %v1672_v7 = vadd.f32 %v3012_v16, %v1494_v4  ;;  %1446 = vmatmul.bf16.gmra.mxu3 %v2211_v57  ;;  %v3059_v4 = vpop.f32.mrf.mxu2 }
 0x2e5   : > { %v1704_v2 = vmax.f32 %v1672_v7, 0.0 }
 0x2e6   : > { %v1407_v12 = vpop.f32.mrf.mxu3 }
 0x2e7   : > { %v2411_v22 = vpack.c.bf16 %v1704_v2, %v1703_v61  ;;  %v1408_v45 = vadd.f32 %v1407_v12, %v2932_v17  ;;  %v2260_v17 = vld [vmem:[%s2782_s8 + $0x1b8] sm:$0xf0]  ;;  %v2243_v2 = vor.u32 %v2390_v59, %v2242_v13 }
 0x2e8   : > { %v3053_v52 = vpop.f32.mrf.mxu1  ;;  %v2292_v13 = vld [vmem:[%s2782_s8 + $0x1f8] sm:$0xf0] }
 0x2e9   : > { %2483 = vst [vmem:[%s3027_s20 + $0x8] sm:$0xff] %v2411_v22   ;;  %v1497_v26 = vadd.f32 %v1496_v54, %v1408_v45  ;;  %v2263_v54 = vor.u32 %v2392_v30, %v2260_v17  ;;  %v2396_v45 = vld [vmem:[%s2782_s8 + $0x1cc] sm:$0xf]  ;;  %v2394_v30 = vld [vmem:[%s2782_s8 + $0x1b4] sm:$0xf0] }
 0x2eb   : > { %v1673_v48 = vadd.f32 %v3012_v16, %v1497_v26  ;;  %1550 = vmatmul.bf16.gmra.mxu1 %v2263_v54 }
 0x2ed   : > { %v1705_v53 = vmax.f32 %v1673_v48, 0.0 }
 0x2ee   : > { %v1409_v39 = vpop.f32.mrf.mxu3 }
 0x2ef   : > { %v1410_v43 = vadd.f32 %v1409_v39, %v2942_v29 }
 0x2f0   : > { %v1513_v63 = vpop.f32.mrf.mxu1 }
 0x2f1   : > { %v1499_v33 = vadd.f32 %v1498_v6, %v1410_v43  ;;  %v1340_v43 = vpop.f32.mrf.mxu2 }
 0x2f3   : > { %v1674_v58 = vadd.f32 %v3012_v16, %v1499_v33  ;;  %1451 = vmatmul.bf16.gmra.mxu3 %v2227_v23  ;;  %v1329_v23 = vadd.f32 %v3022_v35, %v2927_v15  ;;  %v2258_v33 = vld [vmem:[%s2782_s8 + $0x1a8] sm:$0xf]  ;;  %v2400_v35 = vld [vmem:[%s2782_s8 + $0x1ec] sm:$0xf] }
 0x2f5   : > { %v1706_v56 = vmax.f32 %v1674_v58, 0.0  ;;  %v1331_v58 = vadd.f32 %v3033_v50, %v2934_v19 }
 0x2f6   : > { %v1412_v29 = vpop.f32.mrf.mxu3 }
 0x2f7   : > { %v2416_v57 = vpack.c.bf16 %v1706_v56, %v1705_v53  ;;  %v1413_v6 = vadd.f32 %v1412_v29, %v2948_v40  ;;  %v2276_v40 = vld [vmem:[%s2782_s8 + $0x1d8] sm:$0xf0]  ;;  %v2259_v29 = vor.u32 %v2394_v30, %v2258_v33 }
 0x2f8   : > { %v3067_v34 = vpop.f32.mrf.mxu1  ;;  %v2279_v26 = vor.u32 %v2396_v45, %v2276_v40  ;;  %v2398_v45 = vld [vmem:[%s2782_s8 + $0x1d4] sm:$0xf0]  ;;  %v1336_v40 = vadd.f32 %v3051_v0, %v2952_v42  ;;  %v1339_v42 = vadd.f32 %v3059_v4, %v2963_v47 }
 0x2f9   : > { %2484 = vst [vmem:[%s3027_s20 + $0x10] sm:$0xff] %v2416_v57   ;;  %v1502_v7 = vadd.f32 %v3017_v38, %v1413_v6  ;;  %v1343_v57 = vpop.f32.mrf.mxu2 }
 0x2fb   : > { %v1675_v12 = vadd.f32 %v3012_v16, %v1502_v7  ;;  %1555 = vmatmul.bf16.gmra.mxu1 %v2279_v26  ;;  %v2295_v7 = vor.u32 %v2400_v35, %v2292_v13 }
 0x2fd   : > { %v1707_v39 = vmax.f32 %v1675_v12, 0.0 }
 0x2fe   : > { %v1414_v8 = vpop.f32.mrf.mxu3 }
 0x2ff   : > { %v1415_v61 = vadd.f32 %v1414_v8, %v2958_v20 }
 0x300   : > { %v1518_v17 = vpop.f32.mrf.mxu1 }
 0x301   : > { %v1504_v22 = vadd.f32 %v1503_v18, %v1415_v61  ;;  %v1334_v61 = vadd.f32 %v3042_v24, %v2945_v37 }
 0x303   : > { %v1676_v32 = vadd.f32 %v3012_v16, %v1504_v22  ;;  %1456 = vmatmul.bf16.gmra.mxu3 %v2243_v2  ;;  %v2274_v22 = vld [vmem:[%s2782_s8 + $0x1c8] sm:$0xf] }
 0x305   : > { %v1708_v38 = vmax.f32 %v1676_v32, 0.0 }
 0x306   : > { %v1417_v20 = vpop.f32.mrf.mxu3 }
 0x307   : > { %v2421_v18 = vpack.c.bf16 %v1708_v38, %v1707_v39  ;;  %v1418_v48 = vadd.f32 %v1417_v20, %v1329_v23  ;;  %v2275_v38 = vor.u32 %v2398_v45, %v2274_v22 }
 0x309   : > { %2485 = vst [vmem:[%s3027_s20 + $0x18] sm:$0xff] %v2421_v18   ;;  %v1507_v54 = vadd.f32 %v3038_v5, %v1418_v48  ;;  %v1521_v5 = vpop.f32.mrf.mxu1 }
 0x30b   : > { %v1677_v6 = vadd.f32 %v3012_v16, %v1507_v54  ;;  %1560 = vmatmul.bf16.gmra.mxu1 %v2295_v7  ;;  %v2290_v54 = vld [vmem:[%s2782_s8 + $0x1e8] sm:$0xf] }
 0x30d   : > { %v1709_v8 = vmax.f32 %v1677_v6, 0.0 }
 0x30e   : > { %v1419_v53 = vpop.f32.mrf.mxu3 }
 0x30f   : > { %v1420_v56 = vadd.f32 %v1419_v53, %v1331_v58  ;;  %v2402_v53 = vld [vmem:[%s2782_s8 + $0x1f4] sm:$0xf0] }
 0x310   : > { %v2291_v35 = vor.u32 %v2402_v53, %v2290_v54 }
 0x311   : > { %v1509_v15 = vadd.f32 %v1508_v27, %v1420_v56  ;;  %v1345_v27 = vpop.f32.mrf.mxu2  ;;  %v1523_v20 = vpop.f32.mrf.mxu1  ;;  %v1341_v56 = vadd.f32 %v1340_v43, %v2966_v60 }
 0x313   : > { %v1678_v59 = vadd.f32 %v3012_v16, %v1509_v15  ;;  %1461 = vmatmul.bf16.gmra.mxu3 %v2259_v29 }
 0x315   : > { %v1710_v19 = vmax.f32 %v1678_v59, 0.0 }
 0x316   : > { %v1422_v50 = vpop.f32.mrf.mxu3 }
 0x317   : > { %v2426_v2 = vpack.c.bf16 %v1710_v19, %v1709_v8  ;;  %v1423_v12 = vadd.f32 %v1422_v50, %v1334_v61  ;;  %v1344_v50 = vadd.f32 %v1343_v57, %v2975_v3  ;;  %v1346_v61 = vadd.f32 %v1345_v27, %v2980_v10 }
 0x319   : > { %2486 = vst [vmem:[%s3027_s20 + $0x20] sm:$0xff] %v2426_v2   ;;  %v1512_v32 = vadd.f32 %v3053_v52, %v1423_v12  ;;  %v1348_v18 = vpop.f32.mrf.mxu2  ;;  %v1526_v58 = vpop.f32.mrf.mxu1 }
 0x31a   : > { %v1349_v57 = vadd.f32 %v1348_v18, %v2873_v25 }
 0x31b   : > { %v1679_v37 = vadd.f32 %v3012_v16, %v1512_v32 }
 0x31d   : > { %v1711_v48 = vmax.f32 %v1679_v37, 0.0 }
 0x31e   : > { %v1424_v26 = vpop.f32.mrf.mxu3 }
 0x31f   : > { %v1425_v39 = vadd.f32 %v1424_v26, %v1336_v40 }
 0x321   : > { %v1514_v24 = vadd.f32 %v1513_v63, %v1425_v39  ;;  %v1350_v29 = vpop.f32.mrf.mxu2  ;;  %v1528_v4 = vpop.f32.mrf.mxu1 }
 0x323   : > { %v1680_v23 = vadd.f32 %v3012_v16, %v1514_v24  ;;  %1466 = vmatmul.bf16.gmra.mxu3 %v2275_v38 }
 0x325   : > { %v1712_v33 = vmax.f32 %v1680_v23, 0.0 }
 0x326   : > { %v1427_v30 = vpop.f32.mrf.mxu3 }
 0x327   : > { %v2431_v0 = vpack.c.bf16 %v1712_v33, %v1711_v48  ;;  %v1428_v52 = vadd.f32 %v1427_v30, %v1339_v42 }
 0x329   : > { %2487 = vst [vmem:[%s3027_s20 + $0x28] sm:$0xff] %v2431_v0   ;;  %v1517_v63 = vadd.f32 %v3067_v34, %v1428_v52  ;;  %v1353_v43 = vpop.f32.mrf.mxu2  ;;  %v1531_v22 = vpop.f32.mrf.mxu1 }
 0x32a   : > { %v1354_v53 = vadd.f32 %v1353_v43, %v2895_v44 }
 0x32b   : > { %v1681_v13 = vadd.f32 %v3012_v16, %v1517_v63 }
 0x32d   : > { %v1713_v7 = vmax.f32 %v1681_v13, 0.0 }
 0x32e   : > { %v1429_v6 = vpop.f32.mrf.mxu3 }
 0x32f   : > { %v1430_v15 = vadd.f32 %v1429_v6, %v1341_v56 }
 0x331   : > { %v1519_v59 = vadd.f32 %v1518_v17, %v1430_v15  ;;  %v1355_v32 = vpop.f32.mrf.mxu2  ;;  %v1533_v24 = vpop.f32.mrf.mxu1 }
 0x333   : > { %v1682_v47 = vadd.f32 %v3012_v16, %v1519_v59  ;;  %1471 = vmatmul.bf16.gmra.mxu3 %v2291_v35 }
 0x335   : > { %v1714_v8 = vmax.f32 %v1682_v47, 0.0 }
 0x336   : > { %v1432_v19 = vpop.f32.mrf.mxu3 }
 0x337   : > { %v2436_v60 = vpack.c.bf16 %v1714_v8, %v1713_v7  ;;  %v1433_v34 = vadd.f32 %v1432_v19, %v1344_v50 }
 0x339   : > { %2488 = vst [vmem:[%s3027_s20 + $0x30] sm:$0xff] %v2436_v60   ;;  %v1522_v2 = vadd.f32 %v1521_v5, %v1433_v34  ;;  %v1358_v10 = vpop.f32.mrf.mxu2  ;;  %v1351_v5 = vadd.f32 %v1350_v29, %v2879_v36  ;;  %v1536_v42 = vpop.f32.mrf.mxu1 }
 0x33a   : > { %v1359_v19 = vadd.f32 %v1358_v10, %v2912_v51 }
 0x33b   : > { %v1683_v45 = vadd.f32 %v3012_v16, %v1522_v2 }
 0x33d   : > { %v1715_v39 = vmax.f32 %v1683_v45, 0.0 }
 0x33e   : > { %v1434_v12 = vpop.f32.mrf.mxu3 }
 0x33f   : > { %v1435_v17 = vadd.f32 %v1434_v12, %v1346_v61 }
 0x341   : > { %v1524_v40 = vadd.f32 %v1523_v20, %v1435_v17  ;;  %v1360_v25 = vpop.f32.mrf.mxu2  ;;  %v1538_v36 = vpop.f32.mrf.mxu1 }
 0x342   : > { %v1361_v43 = vadd.f32 %v1360_v25, %v2918_v62 }
 0x343   : > { %v1684_v26 = vadd.f32 %v3012_v16, %v1524_v40 }
 0x345   : > { %v1716_v38 = vmax.f32 %v1684_v26, 0.0 }
 0x346   : > { %v1437_v3 = vpop.f32.mrf.mxu3 }
 0x347   : > { %v2441_v37 = vpack.c.bf16 %v1716_v38, %v1715_v39  ;;  %v1438_v23 = vadd.f32 %v1437_v3, %v1349_v57 }
 0x349   : > { %2489 = vst [vmem:[%s3027_s20 + $0x38] sm:$0xff] %v2441_v37   ;;  %v1527_v27 = vadd.f32 %v1526_v58, %v1438_v23  ;;  %v1356_v58 = vadd.f32 %v1355_v32, %v2902_v14  ;;  %v1363_v35 = vpop.f32.mrf.mxu2  ;;  %v1541_v44 = vpop.f32.mrf.mxu1 }
 0x34a   : > { %v1364_v39 = vadd.f32 %v1363_v35, %v2930_v1 }
 0x34b   : > { %v1685_v20 = vadd.f32 %v3012_v16, %v1527_v27 }
 0x34d   : > { %v1717_v52 = vmax.f32 %v1685_v20, 0.0 }
 0x34e   : > { %v1439_v48 = vpop.f32.mrf.mxu3 }
 0x34f   : > { %v1440_v33 = vadd.f32 %v1439_v48, %v1351_v5 }
 0x351   : > { %v1529_v30 = vadd.f32 %v1528_v4, %v1440_v33  ;;  %v1365_v14 = vpop.f32.mrf.mxu2  ;;  %v1543_v12 = vpop.f32.mrf.mxu1 }
 0x352   : > { %v1366_v62 = vadd.f32 %v1365_v14, %v2940_v28 }
 0x353   : > { %v1686_v0 = vadd.f32 %v3012_v16, %v1529_v30 }
 0x355   : > { %v1718_v54 = vmax.f32 %v1686_v0, 0.0 }
 0x356   : > { %v1442_v18 = vpop.f32.mrf.mxu3 }
 0x357   : > { %v2446_v56 = vpack.c.bf16 %v1718_v54, %v1717_v52  ;;  %v1443_v63 = vadd.f32 %v1442_v18, %v1354_v53 }
 0x359   : > { %2490 = vst [vmem:[%s3027_s20 + $0x40] sm:$0xff] %v2446_v56   ;;  %v1532_v29 = vadd.f32 %v1531_v22, %v1443_v63  ;;  %v1368_v40 = vpop.f32.mrf.mxu2  ;;  %v1546_v57 = vpop.f32.mrf.mxu1 }
 0x35b   : > { %v1687_v13 = vadd.f32 %v3012_v16, %v1532_v29 }
 0x35d   : > { %v1719_v4 = vmax.f32 %v1687_v13, 0.0 }
 0x35e   : > { %v1444_v6 = vpop.f32.mrf.mxu3 }
 0x35f   : > { %v1445_v15 = vadd.f32 %v1444_v6, %v1356_v58 }
 0x361   : > { %v1534_v59 = vadd.f32 %v1533_v24, %v1445_v15  ;;  %v1370_v24 = vpop.f32.mrf.mxu2  ;;  %v1548_v33 = vpop.f32.mrf.mxu1 }
 0x362   : > { %v1371_v28 = vadd.f32 %v1370_v24, %v2961_v46 }
 0x363   : > { %v1688_v47 = vadd.f32 %v3012_v16, %v1534_v59 }
 0x365   : > { %v1720_v7 = vmax.f32 %v1688_v47, 0.0 }
 0x366   : > { %v1447_v8 = vpop.f32.mrf.mxu3 }
 0x367   : > { %v2451_v50 = vpack.c.bf16 %v1720_v7, %v1719_v4  ;;  %v1448_v60 = vadd.f32 %v1447_v8, %v1359_v19 }
 0x369   : > { %2491 = vst [vmem:[%s3027_s20 + $0x48] sm:$0xff] %v2451_v50   ;;  %v1537_v34 = vadd.f32 %v1536_v42, %v1448_v60  ;;  %v1369_v42 = vadd.f32 %v1368_v40, %v2950_v41  ;;  %v1373_v52 = vpop.f32.mrf.mxu2  ;;  %v1551_v53 = vpop.f32.mrf.mxu1 }
 0x36a   : > { %v1374_v35 = vadd.f32 %v1373_v52, %v2972_v55 }
 0x36b   : > { %v1689_v22 = vadd.f32 %v3012_v16, %v1537_v34 }
 0x36d   : > { %v1721_v32 = vmax.f32 %v1689_v22, 0.0 }
 0x36e   : > { %v1449_v61 = vpop.f32.mrf.mxu3 }
 0x36f   : > { %v1450_v2 = vadd.f32 %v1449_v61, %v1361_v43 }
 0x371   : > { %v1539_v17 = vadd.f32 %v1538_v36, %v1450_v2  ;;  %v1375_v58 = vpop.f32.mrf.mxu2  ;;  %v1553_v59 = vpop.f32.mrf.mxu1 }
 0x372   : > { %v1376_v4 = vadd.f32 %v1375_v58, %v2978_v9 }
 0x373   : > { %v1690_v45 = vadd.f32 %v3012_v16, %v1539_v17 }
 0x375   : > { %v1722_v26 = vmax.f32 %v1690_v45, 0.0 }
 0x376   : > { %v1452_v51 = vpop.f32.mrf.mxu3 }
 0x377   : > { %v2456_v38 = vpack.c.bf16 %v1722_v26, %v1721_v32  ;;  %v1453_v3 = vadd.f32 %v1452_v51, %v1364_v39 }
 0x379   : > { %2492 = vst [vmem:[%s3027_s20 + $0x50] sm:$0xff] %v2456_v38   ;;  %v1542_v37 = vadd.f32 %v1541_v44, %v1453_v3  ;;  %v1378_v46 = vpop.f32.mrf.mxu2  ;;  %v1556_v60 = vpop.f32.mrf.mxu1 }
 0x37a   : > { %v1379_v2 = vadd.f32 %v1378_v46, %v2986_v21 }
 0x37b   : > { %v1691_v5 = vadd.f32 %v3012_v16, %v1542_v37 }
 0x37d   : > { %v1723_v20 = vmax.f32 %v1691_v5, 0.0 }
 0x37e   : > { %v1454_v23 = vpop.f32.mrf.mxu3 }
 0x37f   : > { %v1455_v10 = vadd.f32 %v1454_v23, %v1366_v62 }
 0x381   : > { %v1544_v27 = vadd.f32 %v1543_v12, %v1455_v10  ;;  %v1380_v55 = vpop.f32.mrf.mxu2  ;;  %v1558_v9 = vpop.f32.mrf.mxu1 }
 0x382   : > { %v1381_v17 = vadd.f32 %v1380_v55, %v2990_v31 }
 0x383   : > { %v1692_v48 = vadd.f32 %v3012_v16, %v1544_v27 }
 0x385   : > { %v1724_v30 = vmax.f32 %v1692_v48, 0.0 }
 0x386   : > { %v1457_v1 = vpop.f32.mrf.mxu3 }
 0x387   : > { %v2461_v0 = vpack.c.bf16 %v1724_v30, %v1723_v20  ;;  %v1458_v54 = vadd.f32 %v1457_v1, %v1369_v42 }
 0x389   : > { %2493 = vst [vmem:[%s3027_s20 + $0x58] sm:$0xff] %v2461_v0   ;;  %v1547_v25 = vadd.f32 %v1546_v57, %v1458_v54  ;;  %v1383_v26 = vpop.f32.mrf.mxu2  ;;  %v1561_v21 = vpop.f32.mrf.mxu1 }
 0x38a   : > { %v1384_v37 = vadd.f32 %v1383_v26, %v2998_v11 }
 0x38b   : > { %v1693_v63 = vadd.f32 %v3012_v16, %v1547_v25 }
 0x38d   : > { %v1725_v6 = vmax.f32 %v1693_v63, 0.0 }
 0x38e   : > { %v1459_v18 = vpop.f32.mrf.mxu3 }
 0x38f   : > { %v1460_v56 = vadd.f32 %v1459_v18, %v1371_v28 }
 0x391   : > { %v1549_v36 = vadd.f32 %v1548_v33, %v1460_v56  ;;  %v1385_v31 = vpop.f32.mrf.mxu2  ;;  %v1563_v33 = vpop.f32.mrf.mxu1 }
 0x392   : > { %v1386_v10 = vadd.f32 %v1385_v31, %v3002_v49 }
 0x393   : > { %v1694_v29 = vadd.f32 %v3012_v16, %v1549_v36 }
 0x395   : > { %v1726_v15 = vmax.f32 %v1694_v29, 0.0 }
 0x396   : > { %v1462_v41 = vpop.f32.mrf.mxu3 }
 0x397   : > { %v2466_v13 = vpack.c.bf16 %v1726_v15, %v1725_v6  ;;  %v1463_v47 = vadd.f32 %v1462_v41, %v1374_v35 }
 0x399   : > { %2494 = vst [vmem:[%s3027_s20 + $0x60] sm:$0xff] %v2466_v13   ;;  %v1552_v7 = vadd.f32 %v1551_v53, %v1463_v47 }
 0x39b   : > { %v1695_v19 = vadd.f32 %v3012_v16, %v1552_v7 }
 0x39d   : > { %v1727_v43 = vmax.f32 %v1695_v19, 0.0 }
 0x39e   : > { %v1464_v8 = vpop.f32.mrf.mxu3 }
 0x39f   : > { %v1465_v44 = vadd.f32 %v1464_v8, %v1376_v4 }
 0x3a1   : > { %v1554_v50 = vadd.f32 %v1553_v59, %v1465_v44 }
 0x3a3   : > { %v1696_v14 = vadd.f32 %v3012_v16, %v1554_v50 }
 0x3a5   : > { %v1728_v34 = vmax.f32 %v1696_v14, 0.0 }
 0x3a6   : > { %v1467_v61 = vpop.f32.mrf.mxu3 }
 0x3a7   : > { %v2471_v12 = vpack.c.bf16 %v1728_v34, %v1727_v43  ;;  %v1468_v22 = vadd.f32 %v1467_v61, %v1379_v2 }
 0x3a9   : > { %2495 = vst [vmem:[%s3027_s20 + $0x68] sm:$0xff] %v2471_v12   ;;  %v1557_v45 = vadd.f32 %v1556_v60, %v1468_v22 }
 0x3ab   : > { %v1697_v51 = vadd.f32 %v3012_v16, %v1557_v45 }
 0x3ad   : > { %v1729_v3 = vmax.f32 %v1697_v51, 0.0 }
 0x3ae   : > { %v1469_v40 = vpop.f32.mrf.mxu3 }
 0x3af   : > { %v1470_v32 = vadd.f32 %v1469_v40, %v1381_v17 }
 0x3b1   : > { %v1559_v39 = vadd.f32 %v1558_v9, %v1470_v32 }
 0x3b3   : > { %v1698_v38 = vadd.f32 %v3012_v16, %v1559_v39 }
 0x3b5   : > { %v1730_v57 = vmax.f32 %v1698_v38, 0.0 }
 0x3b6   : > { %v1472_v62 = vpop.f32.mrf.mxu3 }
 0x3b7   : > { %v2476_v24 = vpack.c.bf16 %v1730_v57, %v1729_v3  ;;  %v1473_v23 = vadd.f32 %v1472_v62, %v1384_v37 }
 0x3b9   : > { %2496 = vst [vmem:[%s3027_s20 + $0x70] sm:$0xff] %v2476_v24   ;;  %v1562_v5 = vadd.f32 %v1561_v21, %v1473_v23 }
 0x3bb   : > { %v1699_v20 = vadd.f32 %v3012_v16, %v1562_v5 }
 0x3bd   : > { %v1731_v42 = vmax.f32 %v1699_v20, 0.0 }
 0x3be   : > { %v1474_v27 = vpop.f32.mrf.mxu3 }
 0x3bf   : > { %v1475_v48 = vadd.f32 %v1474_v27, %v1386_v10 }
 0x3c1   : > { %v1564_v30 = vadd.f32 %v1563_v33, %v1475_v48 }
 0x3c3   : > { %v1700_v1 = vadd.f32 %v3012_v16, %v1564_v30 }
 0x3c5   : > { %v1732_v0 = vmax.f32 %v1700_v1, 0.0 }
 0x3c7   : > { %v2481_v52 = vpack.c.bf16 %v1732_v0, %v1731_v42 }
 0x3c9   : > { %2497 = vst [vmem:[%s3027_s20 + $0x78] sm:$0xff] %v2481_v52  }
 0x3ca PF: > { %s14_s17 = sadd.s32 1, %s2561_s17   ;;  %s3162_s15 = smov %s2557_s16 }
 0x3cb   : > { %p11_p5 = scmp.ge.s32.totalorder %s14_s17, 4   ;;  %s3163_s16 = smov %s3165_s18 }
 0x3cd   :  { %13 = sbr.rel (!%p11_p5) target bundleno = 2 (0x2), region = 75 }

// kernel: _forward_impl.5
= control target key start
LH: loop header
LB: loop body
LE: loop exit
PB: predicated region body
PF: predicated region fallthrough
CT: control target
= control target key end

     0   :  { %s2429_s15 = smov 0   ;;  %s2431_s16 = smov 0   ;;  %s2993_s0 = inlined_call_operand.vmem [shape: bf16[512,512], index: 0, kind: input, shape index: {}]   ;;  %s2994_s1 = inlined_call_operand.vmem [shape: bf16[512,128], index: 1, kind: input, shape index: {}]   ;;  %s2995_s2 = inlined_call_operand.vmem [shape: bf16[128,128], index: 2, kind: input, shape index: {}]   ;;  %s2996_s3 = inlined_call_operand.vmem [shape: f32[1,128], index: 3, kind: input, shape index: {}]   ;;  %s2997_s4 = inlined_call_operand.vmem [shape: f32[512,128], index: 4, kind: output, shape index: {}]  }
   0x1   :  { %s2433_s17 = smov 0  }
   0x2 LB: > { %s26_s18 = sadd.s32 1, %s2398_s16  ;;  %p1810_p0 = scmp.ge.s32.totalorder %s2402_s17, 1  ;;  %s2402_s17 = sphi %s2433_s17, %s14_s17   ;;  %s2398_s16 = sphi %s2431_s16, %s2999_s16   ;;  %s2394_s15 = sphi %s2429_s15, %s2998_s15  }
   0x3   : > { %p28_p1 = scmp.ge.s32.totalorder %s26_s18, 2  ;;  %p183_p2 = scmp.lt.s32.totalorder %s2402_s17, 3 }
   0x5   : > { %s3001_s18 = smov (%p28_p1, %s26_s18), 0  ;;  %p184_p3 = pnand %p1810_p0, %p183_p2 }
   0x6   : > { %s1811_s5 = sshll.u32 (!%p184_p3), %s2394_s15, 5 }
   0x7   : > { %187 = sbr.rel (%p184_p3) target bundleno = 966 (0x3c6), region = 36  ;;  %p216_p4 = scmp.lt.s32.totalorder (!%p184_p3), %s1811_s5, 63 }
   0xc   : > { %v2274_v0 = vld [vmem:[%s2995_s2 + $0x38] sm:$0xff]  ;;  %v2273_v1 = vld [vmem:[%s2995_s2 + $0x30] sm:$0xff]  ;;  %v2272_v2 = vld [vmem:[%s2995_s2 + $0x28] sm:$0xff]  ;;  %s3003_s5 = smov (!%p216_p4, %s1811_s5), 63 }
   0xd   : > { %593 = vmatpush.bf16.msra.mxu0 %v2274_v0  ;;  %2339 = vmatpush.bf16.msra.mxu2 %v2274_v0  ;;  %v2271_v3 = vld [vmem:[%s2995_s2 + $0x20] sm:$0xff]  ;;  %v2270_v4 = vld [vmem:[%s2995_s2 + $0x18] sm:$0xff]  ;;  %v2269_v5 = vld [vmem:[%s2995_s2 + $0x10] sm:$0xff]  ;;  %s2234_s15 = sshll.u32 %s3003_s5, 4  ;;  %s1815_s11 = sshll.u32 %s3003_s5, 3 }
   0xe   : > { %v2268_v6 = vld [vmem:[%s2995_s2 + $0x8] sm:$0xff]  ;;  %v2267_v7 = vld [vmem:[%s2995_s2] sm:$0xff]  ;;  %v2237_v10 = vld [vmem:[%s2994_s1 + $0x10] sm:$0xff]  ;;  %s2623_s8 = scalar_lea.vmem %s2993_s0, %s2234_s15  ;;  %s2857_s20 = scalar_lea.vmem %s2997_s4, %s1815_s11 }
   0xf   : > { %v2235_v8 = vld [vmem:[%s2994_s1] sm:$0xff]  ;;  %v2236_v9 = vld [vmem:[%s2994_s1 + $0x8] sm:$0xff]  ;;  %v2238_v11 = vld [vmem:[%s2994_s1 + $0x18] sm:$0xff] }
  0x10   : > { %v2239_v12 = vld [vmem:[%s2994_s1 + $0x20] sm:$0xff]  ;;  %v2240_v14 = vld [vmem:[%s2994_s1 + $0x28] sm:$0xff]  ;;  %v2241_v15 = vld [vmem:[%s2994_s1 + $0x30] sm:$0xff] }
  0x11   : > { %594 = vmatpush.bf16.msra.mxu0 %v2273_v1  ;;  %2340 = vmatpush.bf16.msra.mxu2 %v2273_v1  ;;  %v2259_v13 = vld [vmem:[%s2994_s1 + $0xc0] sm:$0xff]  ;;  %v2260_v16 = vld [vmem:[%s2994_s1 + $0xc8] sm:$0xff]  ;;  %v2242_v17 = vld [vmem:[%s2994_s1 + $0x38] sm:$0xff] }
  0x12   : > { %v2261_v18 = vld [vmem:[%s2994_s1 + $0xd0] sm:$0xff]  ;;  %v2243_v19 = vld [vmem:[%s2994_s1 + $0x40] sm:$0xff]  ;;  %v2262_v20 = vld [vmem:[%s2994_s1 + $0xd8] sm:$0xff] }
  0x13   : > { %v2244_v24 = vld [vmem:[%s2994_s1 + $0x48] sm:$0xff]  ;;  %v2263_v25 = vld [vmem:[%s2994_s1 + $0xe0] sm:$0xff]  ;;  %v2245_v29 = vld [vmem:[%s2994_s1 + $0x50] sm:$0xff] }
  0x14   : > { %v2264_v30 = vld [vmem:[%s2994_s1 + $0xe8] sm:$0xff]  ;;  %v2246_v34 = vld [vmem:[%s2994_s1 + $0x58] sm:$0xff]  ;;  %v2265_v35 = vld [vmem:[%s2994_s1 + $0xf0] sm:$0xff] }
  0x15   : > { %595 = vmatpush.bf16.msra.mxu0 %v2272_v2  ;;  %2341 = vmatpush.bf16.msra.mxu2 %v2272_v2  ;;  %v2247_v39 = vld [vmem:[%s2994_s1 + $0x60] sm:$0xff]  ;;  %v2266_v40 = vld [vmem:[%s2994_s1 + $0xf8] sm:$0xff]  ;;  %v2248_v43 = vld [vmem:[%s2994_s1 + $0x68] sm:$0xff] }
  0x16   : > { %v2249_v48 = vld [vmem:[%s2994_s1 + $0x70] sm:$0xff]  ;;  %v2250_v53 = vld [vmem:[%s2994_s1 + $0x78] sm:$0xff]  ;;  %v2251_v60 = vld [vmem:[%s2994_s1 + $0x80] sm:$0xff] }
  0x19   : > { %596 = vmatpush.bf16.msra.mxu0 %v2271_v3  ;;  %2342 = vmatpush.bf16.msra.mxu2 %v2271_v3 }
  0x1d   : > { %597 = vmatpush.bf16.msra.mxu0 %v2270_v4  ;;  %2343 = vmatpush.bf16.msra.mxu2 %v2270_v4  ;;  %v2252_v4 = vld [vmem:[%s2994_s1 + $0x88] sm:$0xff] }
  0x21   : > { %598 = vmatpush.bf16.msra.mxu0 %v2269_v5  ;;  %2344 = vmatpush.bf16.msra.mxu2 %v2269_v5 }
  0x25   : > { %599 = vmatpush.bf16.msra.mxu0 %v2268_v6  ;;  %2345 = vmatpush.bf16.msra.mxu2 %v2268_v6 }
  0x29   : > { %600 = vmatpush.bf16.msra.mxu0 %v2267_v7  ;;  %2346 = vmatpush.bf16.msra.mxu2 %v2267_v7 }
  0x2c   : > { %601 = vmatmul.bf16.vlgmr.msra.gmra.mxu0 %v2235_v8  ;;  %721 = vmatmul.bf16.vlgmr.msra.gmra.mxu2 %v2259_v13 }
  0x3c   : > { %606 = vmatmul.bf16.gmra.mxu0 %v2236_v9  ;;  %726 = vmatmul.bf16.gmra.mxu2 %v2260_v16  ;;  %v2254_v16 = vld [vmem:[%s2994_s1 + $0x98] sm:$0xff] }
  0x4c   : > { %611 = vmatmul.bf16.gmra.mxu0 %v2237_v10  ;;  %731 = vmatmul.bf16.gmra.mxu2 %v2261_v18  ;;  %v2253_v10 = vld [vmem:[%s2994_s1 + $0x90] sm:$0xff] }
  0x5c   : > { %616 = vmatmul.bf16.gmra.mxu0 %v2238_v11  ;;  %736 = vmatmul.bf16.gmra.mxu2 %v2262_v20 }
  0x6c   : > { %621 = vmatmul.bf16.gmra.mxu0 %v2239_v12  ;;  %741 = vmatmul.bf16.gmra.mxu2 %v2263_v25 }
  0x7c   : > { %626 = vmatmul.bf16.gmra.mxu0 %v2240_v14  ;;  %746 = vmatmul.bf16.gmra.mxu2 %v2264_v30 }
  0x8c   : > { %631 = vmatmul.bf16.gmra.mxu0 %v2241_v15  ;;  %751 = vmatmul.bf16.gmra.mxu2 %v2265_v35  ;;  %v2257_v35 = vld [vmem:[%s2994_s1 + $0xb0] sm:$0xff] }
  0x9c   : > { %636 = vmatmul.bf16.gmra.mxu0 %v2242_v17  ;;  %756 = vmatmul.bf16.gmra.mxu2 %v2266_v40 }
  0xa9   : > { %v602_v21 = vpop.f32.mrf.mxu0 }
  0xac   : > { %641 = vmatmul.bf16.gmra.mxu0 %v2243_v19 }
  0xaf   : > { %v2543_v45 = vpop.f32.mrf.mxu2 }
  0xb1   : > { %v604_v22 = vpop.f32.mrf.mxu0 }
  0xb2   : > { %v2512_v23 = vpack.c.bf16 %v604_v22, %v602_v21  ;;  %v2255_v22 = vld [vmem:[%s2994_s1 + $0xa0] sm:$0xff] }
  0xb7   : > { %v2545_v47 = vpop.f32.mrf.mxu2 }
  0xb8   : > { %v786_v40 = vpack.c.bf16 %v2545_v47, %v2543_v45  ;;  %v1978_v47 = vld [vmem:[%s2623_s8] sm:$0xf] }
  0xb9   : > { %v607_v26 = vpop.f32.mrf.mxu0 }
  0xbc   : > { %646 = vmatmul.bf16.gmra.mxu0 %v2244_v24 }
  0xbf   : > { %v2550_v50 = vpop.f32.mrf.mxu2 }
  0xc1   : > { %v609_v27 = vpop.f32.mrf.mxu0 }
  0xc2   : > { %v2520_v28 = vpack.c.bf16 %v609_v27, %v607_v26 }
  0xc7   : > { %v2552_v52 = vpop.f32.mrf.mxu2 }
  0xc9   : > { %v612_v31 = vpop.f32.mrf.mxu0 }
  0xcc   : > { %651 = vmatmul.bf16.gmra.mxu0 %v2245_v29 }
  0xcf   : > { %v2557_v55 = vpop.f32.mrf.mxu2 }
  0xd1   : > { %v614_v32 = vpop.f32.mrf.mxu0 }
  0xd2   : > { %v764_v33 = vpack.c.bf16 %v614_v32, %v612_v31 }
  0xd7   : > { %v2559_v58 = vpop.f32.mrf.mxu2 }
  0xd9   : > { %v617_v36 = vpop.f32.mrf.mxu0 }
  0xdc   : > { %656 = vmatmul.bf16.gmra.mxu0 %v2246_v34 }
  0xdf   : > { %v737_v63 = vpop.f32.mrf.mxu2 }
  0xe1   : > { %v619_v37 = vpop.f32.mrf.mxu0 }
  0xe2   : > { %v765_v38 = vpack.c.bf16 %v619_v37, %v617_v36  ;;  %v788_v37 = vpack.c.bf16 %v2559_v58, %v2557_v55 }
  0xe7   : > { %v739_v3 = vpop.f32.mrf.mxu2 }
  0xe8   : > { %v789_v34 = vpack.c.bf16 %v739_v3, %v737_v63  ;;  %v2138_v3 = vld [vmem:[%s2623_s8 + $0x140] sm:$0xf] }
  0xe9   : > { %v622_v41 = vpop.f32.mrf.mxu0 }
  0xec   : > { %661 = vmatmul.bf16.gmra.mxu0 %v2247_v39 }
  0xef   : > { %v742_v6 = vpop.f32.mrf.mxu2 }
  0xf1   : > { %v624_v42 = vpop.f32.mrf.mxu0 }
  0xf2   : > { %v766_v0 = vpack.c.bf16 %v624_v42, %v622_v41  ;;  %v2258_v41 = vld [vmem:[%s2994_s1 + $0xb8] sm:$0xff] }
  0xf7   : > { %v744_v9 = vpop.f32.mrf.mxu2 }
  0xf9   : > { %v627_v44 = vpop.f32.mrf.mxu0 }
  0xfc   : > { %666 = vmatmul.bf16.gmra.mxu0 %v2248_v43  ;;  %v2106_v43 = vld [vmem:[%s2623_s8 + $0x100] sm:$0xf] }
  0xff   : > { %v747_v12 = vpop.f32.mrf.mxu2 }
 0x101   : > { %v629_v46 = vpop.f32.mrf.mxu0 }
 0x102   : > { %v767_v62 = vpack.c.bf16 %v629_v46, %v627_v44  ;;  %v2309_v44 = vld [vmem:[%s2623_s8 + $0x10c] sm:$0xf0] }
 0x103   : > { %v2107_v45 = vor.u32 %v2309_v44, %v2106_v43  ;;  %v2058_v43 = vld [vmem:[%s2623_s8 + $0xa0] sm:$0xf]  ;;  %v2297_v44 = vld [vmem:[%s2623_s8 + $0xac] sm:$0xf0] }
 0x107   : > { %v749_v15 = vpop.f32.mrf.mxu2 }
 0x108   : > { %v791_v31 = vpack.c.bf16 %v749_v15, %v747_v12  ;;  %v2154_v15 = vld [vmem:[%s2623_s8 + $0x160] sm:$0xf] }
 0x109   : > { %v632_v49 = vpop.f32.mrf.mxu0 }
 0x10c   : > { %671 = vmatmul.bf16.gmra.mxu0 %v2249_v48 }
 0x10f   : > { %v752_v18 = vpop.f32.mrf.mxu2 }
 0x111   : > { %v634_v51 = vpop.f32.mrf.mxu0 }
 0x112   : > { %v768_v59 = vpack.c.bf16 %v634_v51, %v632_v49  ;;  %v2277_v49 = vld [vmem:[%s2623_s8 + $0xc] sm:$0xf0] }
 0x117   : > { %v754_v21 = vpop.f32.mrf.mxu2 }
 0x118   : > { %v792_v30 = vpack.c.bf16 %v754_v21, %v752_v18  ;;  %v2289_v21 = vld [vmem:[%s2623_s8 + $0x6c] sm:$0xf0] }
 0x119   : > { %v637_v54 = vpop.f32.mrf.mxu0 }
 0x11c   : > { %676 = vmatmul.bf16.gmra.mxu0 %v2250_v53  ;;  %v2122_v53 = vld [vmem:[%s2623_s8 + $0x120] sm:$0xf] }
 0x11f   : > { %v757_v24 = vpop.f32.mrf.mxu2 }
 0x121   : > { %v639_v56 = vpop.f32.mrf.mxu0 }
 0x122   : > { %v769_v57 = vpack.c.bf16 %v639_v56, %v637_v54  ;;  %v2313_v54 = vld [vmem:[%s2623_s8 + $0x12c] sm:$0xf0] }
 0x123   : > { %v2123_v56 = vor.u32 %v2313_v54, %v2122_v53 }
 0x124   : > { %1210 = vmatpush.bf16.msra.mxu1 %v769_v57  ;;  %2347 = vmatpush.bf16.msra.mxu3 %v769_v57 }
 0x127   : > { %v759_v26 = vpop.f32.mrf.mxu2 }
 0x128   : > { %1211 = vmatpush.bf16.msra.mxu1 %v768_v59  ;;  %2348 = vmatpush.bf16.msra.mxu3 %v768_v59  ;;  %v793_v27 = vpack.c.bf16 %v759_v26, %v757_v24  ;;  %v1994_v59 = vld [vmem:[%s2623_s8 + $0x20] sm:$0xf] }
 0x129   : > { %v2564_v61 = vpop.f32.mrf.mxu0  ;;  %v2170_v24 = vld [vmem:[%s2623_s8 + $0x180] sm:$0xf] }
 0x12c   : > { %681 = vmatmul.bf16.gmra.mxu0 %v2251_v60  ;;  %1212 = vmatpush.bf16.msra.mxu1 %v767_v62 }
 0x12d   : > { %2349 = vmatpush.bf16.msra.mxu3 %v767_v62  ;;  %v2281_v62 = vld [vmem:[%s2623_s8 + $0x2c] sm:$0xf0] }
 0x12e   : > { %v1995_v63 = vor.u32 %v2281_v62, %v1994_v59  ;;  %v2218_v62 = vld [vmem:[%s2623_s8 + $0x1e0] sm:$0xf] }
 0x130   : > { %1213 = vmatpush.bf16.msra.mxu1 %v766_v0 }
 0x131   : > { %2350 = vmatpush.bf16.msra.mxu3 %v766_v0  ;;  %v2566_v1 = vpop.f32.mrf.mxu0 }
 0x132   : > { %v770_v2 = vpack.c.bf16 %v2566_v1, %v2564_v61  ;;  %v2279_v1 = vld [vmem:[%s2623_s8 + $0x24] sm:$0xf] }
 0x134   : > { %1214 = vmatpush.bf16.msra.mxu1 %v765_v38 }
 0x135   : > { %2351 = vmatpush.bf16.msra.mxu3 %v765_v38  ;;  %v787_v38 = vpack.c.bf16 %v2552_v52, %v2550_v50  ;;  %v1979_v50 = vor.u32 %v2277_v49, %v1978_v47  ;;  %v2202_v47 = vld [vmem:[%s2623_s8 + $0x1c0] sm:$0xf] }
 0x138   : > { %1215 = vmatpush.bf16.msra.mxu1 %v764_v33 }
 0x139   : > { %2352 = vmatpush.bf16.msra.mxu3 %v764_v33  ;;  %v2573_v5 = vpop.f32.mrf.mxu0  ;;  %v790_v33 = vpack.c.bf16 %v744_v9, %v742_v6  ;;  %v2275_v9 = vld [vmem:[%s2623_s8 + $0x4] sm:$0xf] }
 0x13c   : > { %686 = vmatmul.bf16.gmra.mxu0 %v2252_v4  ;;  %1216 = vmatpush.bf16.msra.mxu1 %v2520_v28  ;;  %v2317_v4 = vld [vmem:[%s2623_s8 + $0x14c] sm:$0xf0] }
 0x13d   : > { %2353 = vmatpush.bf16.msra.mxu3 %v2520_v28  ;;  %v2256_v28 = vld [vmem:[%s2994_s1 + $0xa8] sm:$0xff]  ;;  %v2139_v6 = vor.u32 %v2317_v4, %v2138_v3  ;;  %v2295_v4 = vld [vmem:[%s2623_s8 + $0xa4] sm:$0xf] }
 0x140   : > { %1217 = vmatpush.bf16.msra.mxu1 %v2512_v23 }
 0x141   : > { %2354 = vmatpush.bf16.msra.mxu3 %v2512_v23  ;;  %v2579_v7 = vpop.f32.mrf.mxu0 }
 0x142   : > { %v771_v8 = vpack.c.bf16 %v2579_v7, %v2573_v5  ;;  %v2285_v5 = vld [vmem:[%s2623_s8 + $0x4c] sm:$0xf0] }
 0x143   : > { %1218 = vmatmul.bf16.vlgmr.msra.gmra.mxu1 %v1979_v50  ;;  %v2291_v50 = vld [vmem:[%s2623_s8 + $0x84] sm:$0xf] }
 0x144   : > { %1477 = vmatpush.bf16.msrb.mxu1 %v793_v27  ;;  %1258 = vmatmul.bf16.vlgmr.msra.gmra.mxu3 %v2107_v45  ;;  %v2283_v27 = vld [vmem:[%s2623_s8 + $0x44] sm:$0xf]  ;;  %v2059_v45 = vor.u32 %v2297_v44, %v2058_v43  ;;  %v2278_v43 = vld [vmem:[%s2623_s8 + $0x14] sm:$0xf0] }
 0x148   : > { %1478 = vmatpush.bf16.msrb.mxu1 %v792_v30 }
 0x149   : > { %v2586_v11 = vpop.f32.mrf.mxu0 }
 0x14c   : > { %691 = vmatmul.bf16.gmra.mxu0 %v2253_v10  ;;  %1479 = vmatpush.bf16.msrb.mxu1 %v791_v31  ;;  %v1980_v10 = vld [vmem:[%s2623_s8 + $0x10] sm:$0xf0]  ;;  %v2042_v31 = vld [vmem:[%s2623_s8 + $0x80] sm:$0xf] }
 0x14d   : > { %v1983_v12 = vor.u32 %v2275_v9, %v1980_v10 }
 0x150   : > { %1480 = vmatpush.bf16.msrb.mxu1 %v790_v33  ;;  %v2293_v33 = vld [vmem:[%s2623_s8 + $0x8c] sm:$0xf0] }
 0x151   : > { %v2588_v13 = vpop.f32.mrf.mxu0 }
 0x152   : > { %v772_v14 = vpack.c.bf16 %v2588_v13, %v2586_v11  ;;  %v2010_v13 = vld [vmem:[%s2623_s8 + $0x40] sm:$0xf] }
 0x153   : > { %1223 = vmatmul.bf16.gmra.mxu1 %v1995_v63  ;;  %v2011_v7 = vor.u32 %v2285_v5, %v2010_v13  ;;  %v2337_v63 = vld [vmem:[%s2623_s8 + $0x1ec] sm:$0xf0] }
 0x154   : > { %1481 = vmatpush.bf16.msrb.mxu1 %v789_v34  ;;  %1263 = vmatmul.bf16.gmra.mxu3 %v2123_v56  ;;  %v2043_v34 = vor.u32 %v2293_v33, %v2042_v31  ;;  %v2301_v56 = vld [vmem:[%s2623_s8 + $0xcc] sm:$0xf0]  ;;  %v2219_v3 = vor.u32 %v2337_v63, %v2218_v62 }
 0x155   : > { %v2305_v13 = vld [vmem:[%s2623_s8 + $0xec] sm:$0xf0] }
 0x158   : > { %1482 = vmatpush.bf16.msrb.mxu1 %v788_v37  ;;  %v2329_v37 = vld [vmem:[%s2623_s8 + $0x1ac] sm:$0xf0] }
 0x159   : > { %v2595_v17 = vpop.f32.mrf.mxu0 }
 0x15c   : > { %696 = vmatmul.bf16.gmra.mxu0 %v2254_v16  ;;  %1483 = vmatpush.bf16.msrb.mxu1 %v787_v38  ;;  %v2321_v16 = vld [vmem:[%s2623_s8 + $0x16c] sm:$0xf0] }
 0x15d   : > { %v2155_v61 = vor.u32 %v2321_v16, %v2154_v15  ;;  %v2299_v15 = vld [vmem:[%s2623_s8 + $0xc4] sm:$0xf]  ;;  %v2076_v16 = vld [vmem:[%s2623_s8 + $0xd0] sm:$0xf0] }
 0x160   : > { %1484 = vmatpush.bf16.msrb.mxu1 %v786_v40  ;;  %v2028_v40 = vld [vmem:[%s2623_s8 + $0x70] sm:$0xf0] }
 0x161   : > { %v2597_v19 = vpop.f32.mrf.mxu0 }
 0x162   : > { %v773_v20 = vpack.c.bf16 %v2597_v19, %v2595_v17  ;;  %v2026_v19 = vld [vmem:[%s2623_s8 + $0x60] sm:$0xf] }
 0x163   : > { %1228 = vmatmul.bf16.gmra.mxu1 %v2011_v7 }
 0x164   : > { %1268 = vmatmul.bf16.gmra.mxu3 %v2139_v6  ;;  %v2060_v6 = vld [vmem:[%s2623_s8 + $0xb0] sm:$0xf0] }
 0x165   : > { %v2063_v9 = vor.u32 %v2295_v4, %v2060_v6  ;;  %v2140_v4 = vld [vmem:[%s2623_s8 + $0x150] sm:$0xf0]  ;;  %v2018_v6 = vld [vmem:[%s2623_s8 + $0x48] sm:$0xf] }
 0x169   : > { %v662_v23 = vpop.f32.mrf.mxu0 }
 0x16c   : > { %701 = vmatmul.bf16.gmra.mxu0 %v2255_v22  ;;  %v2027_v22 = vor.u32 %v2289_v21, %v2026_v19  ;;  %v1988_v21 = vld [vmem:[%s2623_s8 + $0x18] sm:$0xf0] }
 0x171   : > { %v664_v25 = vpop.f32.mrf.mxu0 }
 0x172   : > { %v774_v57 = vpack.c.bf16 %v664_v25, %v662_v23  ;;  %v2325_v25 = vld [vmem:[%s2623_s8 + $0x18c] sm:$0xf0] }
 0x173   : > { %1233 = vmatmul.bf16.gmra.mxu1 %v2027_v22  ;;  %v2171_v26 = vor.u32 %v2325_v25, %v2170_v24 }
 0x174   : > { %1273 = vmatmul.bf16.gmra.mxu3 %v2155_v61  ;;  %v2079_v61 = vor.u32 %v2299_v15, %v2076_v16  ;;  %v2052_v16 = vld [vmem:[%s2623_s8 + $0x98] sm:$0xf0] }
 0x179   : > { %v667_v29 = vpop.f32.mrf.mxu0 }
 0x17c   : > { %706 = vmatmul.bf16.gmra.mxu0 %v2256_v28  ;;  %v2012_v28 = vld [vmem:[%s2623_s8 + $0x50] sm:$0xf0] }
 0x181   : > { %v669_v32 = vpop.f32.mrf.mxu0 }
 0x182   : > { %v775_v55 = vpack.c.bf16 %v669_v32, %v667_v29  ;;  %v2015_v29 = vor.u32 %v2283_v27, %v2012_v28  ;;  %v2303_v28 = vld [vmem:[%s2623_s8 + $0xe4] sm:$0xf] }
 0x183   : > { %1238 = vmatmul.bf16.gmra.mxu1 %v2043_v34  ;;  %v2280_v34 = vld [vmem:[%s2623_s8 + $0x2c] sm:$0xf] }
 0x184   : > { %1278 = vmatmul.bf16.gmra.mxu3 %v2171_v26 }
 0x189   : > { %v672_v36 = vpop.f32.mrf.mxu0 }
 0x18c   : > { %711 = vmatmul.bf16.gmra.mxu0 %v2257_v35 }
 0x191   : > { %v674_v39 = vpop.f32.mrf.mxu0 }
 0x192   : > { %v776_v51 = vpack.c.bf16 %v674_v39, %v672_v36  ;;  %v2186_v36 = vld [vmem:[%s2623_s8 + $0x1a0] sm:$0xf]  ;;  %v2287_v39 = vld [vmem:[%s2623_s8 + $0x64] sm:$0xf] }
 0x193   : > { %v2187_v38 = vor.u32 %v2329_v37, %v2186_v36  ;;  %1243 = vmatmul.bf16.gmra.mxu1 %v2059_v45 }
 0x195   : > { %1283 = vmatmul.bf16.gmra.mxu3 %v2187_v38  ;;  %v2004_v38 = vld [vmem:[%s2623_s8 + $0x38] sm:$0xf0] }
 0x199   : > { %v677_v42 = vpop.f32.mrf.mxu0 }
 0x19c   : > { %716 = vmatmul.bf16.gmra.mxu0 %v2258_v41  ;;  %v2031_v41 = vor.u32 %v2287_v39, %v2028_v40  ;;  %v2007_v39 = vor.u32 %v2280_v34, %v2004_v38  ;;  %v2307_v40 = vld [vmem:[%s2623_s8 + $0x104] sm:$0xf]  ;;  %v2296_v34 = vld [vmem:[%s2623_s8 + $0xac] sm:$0xf]  ;;  %v2068_v38 = vld [vmem:[%s2623_s8 + $0xb8] sm:$0xf0] }
 0x1a1   : > { %v679_v46 = vpop.f32.mrf.mxu0 }
 0x1a2   : > { %v777_v48 = vpack.c.bf16 %v679_v46, %v677_v42 }
 0x1a4   : > { %1299 = vmatpush.bf16.msrb.mxu2 %v777_v48  ;;  %v2333_v48 = vld [vmem:[%s2623_s8 + $0x1cc] sm:$0xf0] }
 0x1a5   : > { %v2203_v49 = vor.u32 %v2333_v48, %v2202_v47  ;;  %v2124_v47 = vld [vmem:[%s2623_s8 + $0x130] sm:$0xf0] }
 0x1a7   : > { %1288 = vmatmul.bf16.gmra.mxu3 %v2203_v49 }
 0x1a8   : > { %1300 = vmatpush.bf16.msrb.mxu2 %v776_v51  ;;  %v2044_v51 = vld [vmem:[%s2623_s8 + $0x90] sm:$0xf0] }
 0x1a9   : > { %v2632_v52 = vpop.f32.mrf.mxu0  ;;  %v2047_v53 = vor.u32 %v2291_v50, %v2044_v51 }
 0x1ac   : > { %1301 = vmatpush.bf16.msrb.mxu2 %v775_v55  ;;  %v2074_v55 = vld [vmem:[%s2623_s8 + $0xc0] sm:$0xf] }
 0x1b0   : > { %1302 = vmatpush.bf16.msrb.mxu2 %v774_v57  ;;  %v2075_v57 = vor.u32 %v2301_v56, %v2074_v55  ;;  %v2036_v55 = vld [vmem:[%s2623_s8 + $0x78] sm:$0xf0] }
 0x1b1   : > { %v2636_v58 = vpop.f32.mrf.mxu0 }
 0x1b2   : > { %v778_v60 = vpack.c.bf16 %v2636_v58, %v2632_v52  ;;  %1248 = vmatmul.bf16.gmra.mxu1 %v2075_v57  ;;  %v2002_v52 = vld [vmem:[%s2623_s8 + $0x28] sm:$0xf]  ;;  %v2282_v58 = vld [vmem:[%s2623_s8 + $0x34] sm:$0xf0] }
 0x1b3   : > { %v2003_v50 = vor.u32 %v2282_v58, %v2002_v52  ;;  %v2084_v52 = vld [vmem:[%s2623_s8 + $0xd8] sm:$0xf0] }
 0x1b4   : > { %1303 = vmatpush.bf16.msrb.mxu2 %v773_v20 }
 0x1b7   : > { %1293 = vmatmul.bf16.gmra.mxu3 %v2219_v3  ;;  %v2315_v3 = vld [vmem:[%s2623_s8 + $0x144] sm:$0xf] }
 0x1b8   : > { %1304 = vmatpush.bf16.msrb.mxu2 %v772_v14 }
 0x1b9   : > { %v2648_v0 = vpop.f32.mrf.mxu0 }
 0x1bc   : > { %1305 = vmatpush.bf16.msrb.mxu2 %v771_v8 }
 0x1c0   : > { %1306 = vmatpush.bf16.msrb.mxu2 %v770_v2  ;;  %v1996_v2 = vld [vmem:[%s2623_s8 + $0x30] sm:$0xf0]  ;;  %v1219_v19 = vpop.f32.mrf.mxu1 }
 0x1c1   : > { %v2660_v11 = vpop.f32.mrf.mxu0  ;;  %v1999_v17 = vor.u32 %v2279_v1, %v1996_v2  ;;  %v2276_v2 = vld [vmem:[%s2623_s8 + $0xc] sm:$0xf] }
 0x1c2   : > { %v779_v14 = vpack.c.bf16 %v2660_v11, %v2648_v0  ;;  %v1991_v22 = vor.u32 %v2276_v2, %v1988_v21  ;;  %v2319_v21 = vld [vmem:[%s2623_s8 + $0x164] sm:$0xf] }
 0x1c3   : > { %1307 = vmatmul.bf16.vlgmr.msrb.gmra.mxu2 %v1983_v12  ;;  %v2090_v12 = vld [vmem:[%s2623_s8 + $0xe0] sm:$0xf] }
 0x1c4   : > { %v2091_v5 = vor.u32 %v2305_v13, %v2090_v12  ;;  %v2143_v13 = vor.u32 %v2315_v3, %v2140_v4  ;;  %v2100_v4 = vld [vmem:[%s2623_s8 + $0xf8] sm:$0xf0] }
 0x1c6   : > { %1253 = vmatmul.bf16.gmra.mxu1 %v2091_v5 }
 0x1c7   : > { %v2714_v25 = vpop.f32.mrf.mxu3 }
 0x1c8   : > { %v1221_v27 = vpop.f32.mrf.mxu1 }
 0x1c9   : > { %v2666_v8 = vpop.f32.mrf.mxu0 }
 0x1cf   : > { %v2720_v36 = vpop.f32.mrf.mxu3 }
 0x1d0   : > { %v1224_v37 = vpop.f32.mrf.mxu1 }
 0x1d1   : > { %v2672_v18 = vpop.f32.mrf.mxu0 }
 0x1d2   : > { %v780_v20 = vpack.c.bf16 %v2672_v18, %v2666_v8  ;;  %v2284_v8 = vld [vmem:[%s2623_s8 + $0x4c] sm:$0xf] }
 0x1d3   : > { %1312 = vmatmul.bf16.gmra.mxu2 %v1999_v17 }
 0x1d6   : > { %1485 = vmatmul.bf16.vlgmr.msrb.gmra.mxu1 %v1991_v22  ;;  %v2156_v22 = vld [vmem:[%s2623_s8 + $0x170] sm:$0xf0] }
 0x1d7   : > { %v2736_v44 = vpop.f32.mrf.mxu3 }
 0x1d9   : > { %v2678_v23 = vpop.f32.mrf.mxu0 }
 0x1e1   : > { %v2684_v30 = vpop.f32.mrf.mxu0 }
 0x1e2   : > { %v781_v32 = vpack.c.bf16 %v2684_v30, %v2678_v23 }
 0x1e3   : > { %1317 = vmatmul.bf16.gmra.mxu2 %v2015_v29  ;;  %v2092_v29 = vld [vmem:[%s2623_s8 + $0xf0] sm:$0xf0] }
 0x1e4   : > { %v2095_v33 = vor.u32 %v2303_v28, %v2092_v29 }
 0x1e6   : > { %1490 = vmatmul.bf16.gmra.mxu1 %v2007_v39  ;;  %v2071_v39 = vor.u32 %v2296_v34, %v2068_v38  ;;  %v2335_v34 = vld [vmem:[%s2623_s8 + $0x1e4] sm:$0xf]  ;;  %v2220_v38 = vld [vmem:[%s2623_s8 + $0x1f0] sm:$0xf0] }
 0x1e9   : > { %v2690_v35 = vpop.f32.mrf.mxu0 }
 0x1f1   : > { %v704_v42 = vpop.f32.mrf.mxu0 }
 0x1f2   : > { %v782_v31 = vpack.c.bf16 %v704_v42, %v2690_v35  ;;  %v1226_v35 = vpop.f32.mrf.mxu1  ;;  %v1986_v42 = vld [vmem:[%s2623_s8 + $0x8] sm:$0xf] }
 0x1f3   : > { %1322 = vmatmul.bf16.gmra.mxu2 %v2031_v41  ;;  %v2108_v41 = vld [vmem:[%s2623_s8 + $0x110] sm:$0xf0]  ;;  %v1987_v30 = vor.u32 %v2278_v43, %v1986_v42  ;;  %v2323_v43 = vld [vmem:[%s2623_s8 + $0x184] sm:$0xf] }
 0x1f4   : > { %v2111_v23 = vor.u32 %v2307_v40, %v2108_v41 }
 0x1f9   : > { %v707_v46 = vpop.f32.mrf.mxu0 }
 0x1fa   : > { %v1229_v18 = vpop.f32.mrf.mxu1 }
 0x201   : > { %v709_v54 = vpop.f32.mrf.mxu0 }
 0x202   : > { %v783_v26 = vpack.c.bf16 %v709_v54, %v707_v46  ;;  %v1231_v45 = vpop.f32.mrf.mxu1  ;;  %v2311_v46 = vld [vmem:[%s2623_s8 + $0x124] sm:$0xf] }
 0x203   : > { %1327 = vmatmul.bf16.gmra.mxu2 %v2047_v53  ;;  %v2127_v49 = vor.u32 %v2311_v46, %v2124_v47  ;;  %v2288_v53 = vld [vmem:[%s2623_s8 + $0x6c] sm:$0xf] }
 0x204   : > { %v2039_v56 = vor.u32 %v2288_v53, %v2036_v55  ;;  %v2066_v53 = vld [vmem:[%s2623_s8 + $0xa8] sm:$0xf] }
 0x209   : > { %v712_v59 = vpop.f32.mrf.mxu0 }
 0x20a   : > { %v1234_v54 = vpop.f32.mrf.mxu1 }
 0x211   : > { %v714_v10 = vpop.f32.mrf.mxu0 }
 0x212   : > { %v784_v24 = vpack.c.bf16 %v714_v10, %v712_v59  ;;  %v1236_v63 = vpop.f32.mrf.mxu1 }
 0x213   : > { %1332 = vmatmul.bf16.gmra.mxu2 %v2063_v9  ;;  %v2286_v9 = vld [vmem:[%s2623_s8 + $0x54] sm:$0xf0] }
 0x214   : > { %v2019_v5 = vor.u32 %v2286_v9, %v2018_v6 }
 0x219   : > { %v717_v7 = vpop.f32.mrf.mxu0 }
 0x21a   : > { %v2768_v15 = vpop.f32.mrf.mxu1 }
 0x221   : > { %v719_v1 = vpop.f32.mrf.mxu0 }
 0x222   : > { %v785_v17 = vpack.c.bf16 %v719_v1, %v717_v7  ;;  %v2292_v7 = vld [vmem:[%s2623_s8 + $0x8c] sm:$0xf] }
 0x223   : > { %1337 = vmatmul.bf16.gmra.mxu2 %v2079_v61  ;;  %v2055_v61 = vor.u32 %v2292_v7, %v2052_v16  ;;  %v2082_v7 = vld [vmem:[%s2623_s8 + $0xc8] sm:$0xf]  ;;  %v2302_v16 = vld [vmem:[%s2623_s8 + $0xd4] sm:$0xf0] }
 0x224   : > { %1388 = vmatpush.bf16.msrb.mxu3 %v785_v17 }
 0x228   : > { %1389 = vmatpush.bf16.msrb.mxu3 %v784_v24  ;;  %v2034_v24 = vld [vmem:[%s2623_s8 + $0x68] sm:$0xf] }
 0x22c   : > { %1390 = vmatpush.bf16.msrb.mxu3 %v783_v26  ;;  %v2290_v26 = vld [vmem:[%s2623_s8 + $0x74] sm:$0xf0] }
 0x230   : > { %1391 = vmatpush.bf16.msrb.mxu3 %v782_v31  ;;  %v2159_v31 = vor.u32 %v2319_v21, %v2156_v22  ;;  %v2308_v22 = vld [vmem:[%s2623_s8 + $0x10c] sm:$0xf] }
 0x233   : > { %1342 = vmatmul.bf16.gmra.mxu2 %v2095_v33  ;;  %v2035_v33 = vor.u32 %v2290_v26, %v2034_v24  ;;  %v2116_v24 = vld [vmem:[%s2623_s8 + $0x118] sm:$0xf0] }
 0x234   : > { %1392 = vmatpush.bf16.msrb.mxu3 %v781_v32 }
 0x238   : > { %1393 = vmatpush.bf16.msrb.mxu3 %v780_v20  ;;  %v2020_v20 = vld [vmem:[%s2623_s8 + $0x58] sm:$0xf0] }
 0x239   : > { %v2023_v0 = vor.u32 %v2284_v8, %v2020_v20  ;;  %v2294_v8 = vld [vmem:[%s2623_s8 + $0x94] sm:$0xf0] }
 0x23b   : > { %1495 = vmatmul.bf16.gmra.mxu1 %v2023_v0 }
 0x23c   : > { %1394 = vmatpush.bf16.msrb.mxu3 %v779_v14  ;;  %v2743_v14 = vpop.f32.mrf.mxu3 }
 0x240   : > { %1395 = vmatpush.bf16.msrb.mxu3 %v778_v60 }
 0x243   : > { %1347 = vmatmul.bf16.gmra.mxu2 %v2111_v23  ;;  %1396 = vmatmul.bf16.vlgmr.msrb.gmra.mxu3 %v1987_v30  ;;  %v2172_v23 = vld [vmem:[%s2623_s8 + $0x190] sm:$0xf0]  ;;  %v2050_v30 = vld [vmem:[%s2623_s8 + $0x88] sm:$0xf] }
 0x244   : > { %v2753_v51 = vpop.f32.mrf.mxu3  ;;  %v2175_v0 = vor.u32 %v2323_v43, %v2172_v23  ;;  %v2223_v43 = vor.u32 %v2335_v34, %v2220_v38  ;;  %v2164_v34 = vld [vmem:[%s2623_s8 + $0x178] sm:$0xf0] }
 0x246   : > { %v1308_v11 = vpop.f32.mrf.mxu2 }
 0x247   : > { %v2745_v32 = vadd.f32 %v1308_v11, %v1219_v19  ;;  %v2775_v19 = vpop.f32.mrf.mxu1  ;;  %v2051_v11 = vor.u32 %v2294_v8, %v2050_v30  ;;  %v2312_v30 = vld [vmem:[%s2623_s8 + $0x12c] sm:$0xf] }
 0x24b   : > { %1500 = vmatmul.bf16.gmra.mxu1 %v2039_v56 }
 0x24c   : > { %v2759_v62 = vpop.f32.mrf.mxu3 }
 0x24e   : > { %v1310_v60 = vpop.f32.mrf.mxu2 }
 0x24f   : > { %v2751_v48 = vadd.f32 %v1310_v60, %v1221_v27 }
 0x253   : > { %1352 = vmatmul.bf16.gmra.mxu2 %v2127_v49  ;;  %1401 = vmatmul.bf16.gmra.mxu3 %v2003_v50  ;;  %v2327_v49 = vld [vmem:[%s2623_s8 + $0x1a4] sm:$0xf]  ;;  %v2188_v50 = vld [vmem:[%s2623_s8 + $0x1b0] sm:$0xf0] }
 0x254   : > { %v2771_v1 = vpop.f32.mrf.mxu3  ;;  %v2191_v56 = vor.u32 %v2327_v49, %v2188_v50 }
 0x256   : > { %v1313_v57 = vpop.f32.mrf.mxu2 }
 0x257   : > { %v2757_v59 = vadd.f32 %v1313_v57, %v1224_v37  ;;  %v2786_v37 = vpop.f32.mrf.mxu1 }
 0x25b   : > { %1505 = vmatmul.bf16.gmra.mxu1 %v2055_v61 }
 0x25c   : > { %v2781_v28 = vpop.f32.mrf.mxu3 }
 0x25e   : > { %v1315_v10 = vpop.f32.mrf.mxu2 }
 0x25f   : > { %v2765_v12 = vadd.f32 %v1315_v10, %v1226_v35  ;;  %v2793_v42 = vpop.f32.mrf.mxu1 }
 0x263   : > { %1357 = vmatmul.bf16.gmra.mxu2 %v2143_v13  ;;  %1406 = vmatmul.bf16.gmra.mxu3 %v2019_v5  ;;  %v2331_v13 = vld [vmem:[%s2623_s8 + $0x1c4] sm:$0xf]  ;;  %v2204_v5 = vld [vmem:[%s2623_s8 + $0x1d0] sm:$0xf0] }
 0x264   : > { %v2791_v41 = vpop.f32.mrf.mxu3  ;;  %v2207_v61 = vor.u32 %v2331_v13, %v2204_v5 }
 0x266   : > { %v1318_v2 = vpop.f32.mrf.mxu2 }
 0x267   : > { %v2773_v17 = vadd.f32 %v1318_v2, %v1229_v18  ;;  %v2804_v47 = vpop.f32.mrf.mxu1  ;;  %v2083_v2 = vor.u32 %v2302_v16, %v2082_v7  ;;  %v2130_v16 = vld [vmem:[%s2623_s8 + $0x128] sm:$0xf] }
 0x26b   : > { %1510 = vmatmul.bf16.gmra.mxu1 %v2071_v39  ;;  %v2098_v39 = vld [vmem:[%s2623_s8 + $0xe8] sm:$0xf] }
 0x26c   : > { %v2802_v46 = vpop.f32.mrf.mxu3 }
 0x26e   : > { %v1320_v27 = vpop.f32.mrf.mxu2 }
 0x26f   : > { %v2783_v29 = vadd.f32 %v1320_v27, %v1231_v45  ;;  %v2300_v45 = vld [vmem:[%s2623_s8 + $0xcc] sm:$0xf]  ;;  %v2807_v60 = vpop.f32.mrf.mxu1  ;;  %v2119_v27 = vor.u32 %v2308_v22, %v2116_v24 }
 0x270   : > { %v2087_v58 = vor.u32 %v2300_v45, %v2084_v52  ;;  %v2114_v52 = vld [vmem:[%s2623_s8 + $0x108] sm:$0xf] }
 0x273   : > { %1362 = vmatmul.bf16.gmra.mxu2 %v2159_v31  ;;  %1411 = vmatmul.bf16.gmra.mxu3 %v2035_v33 }
 0x274   : > { %v2813_v55 = vpop.f32.mrf.mxu3 }
 0x276   : > { %v1323_v35 = vpop.f32.mrf.mxu2 }
 0x277   : > { %v2789_v40 = vadd.f32 %v1323_v35, %v1234_v54  ;;  %v2298_v54 = vld [vmem:[%s2623_s8 + $0xb4] sm:$0xf0]  ;;  %v2816_v3 = vpop.f32.mrf.mxu1 }
 0x278   : > { %v2067_v57 = vor.u32 %v2298_v54, %v2066_v53  ;;  %v2306_v35 = vld [vmem:[%s2623_s8 + $0xf4] sm:$0xf0]  ;;  %v2316_v53 = vld [vmem:[%s2623_s8 + $0x14c] sm:$0xf] }
 0x279   : > { %v2099_v23 = vor.u32 %v2306_v35, %v2098_v39 }
 0x27b   : > { %1515 = vmatmul.bf16.gmra.mxu1 %v2087_v58  ;;  %v2310_v58 = vld [vmem:[%s2623_s8 + $0x114] sm:$0xf0] }
 0x27c   : > { %v2819_v9 = vpop.f32.mrf.mxu3  ;;  %v2115_v50 = vor.u32 %v2310_v58, %v2114_v52 }
 0x27e   : > { %v1325_v18 = vpop.f32.mrf.mxu2 }
 0x27f   : > { %v2799_v20 = vadd.f32 %v1325_v18, %v1236_v63  ;;  %v2304_v63 = vld [vmem:[%s2623_s8 + $0xec] sm:$0xf]  ;;  %v2821_v10 = vpop.f32.mrf.mxu1  ;;  %v2132_v18 = vld [vmem:[%s2623_s8 + $0x138] sm:$0xf0] }
 0x280   : > { %v2103_v6 = vor.u32 %v2304_v63, %v2100_v4 }
 0x283   : > { %1367 = vmatmul.bf16.gmra.mxu2 %v2175_v0  ;;  %1416 = vmatmul.bf16.gmra.mxu3 %v2051_v11  ;;  %v2135_v0 = vor.u32 %v2312_v30, %v2132_v18  ;;  %v2146_v18 = vld [vmem:[%s2623_s8 + $0x148] sm:$0xf] }
 0x284   : > { %v2827_v21 = vpop.f32.mrf.mxu3 }
 0x286   : > { %v2867_v35 = vpop.f32.mrf.mxu2 }
 0x287   : > { %v1486_v26 = vpop.f32.mrf.mxu1 }
 0x28b   : > { %1520 = vmatmul.bf16.gmra.mxu1 %v2103_v6  ;;  %v2852_v6 = vld [vmem:[%s2996_s3] ss:$0 sm:$0xff] }
 0x28c   : > { %v2831_v31 = vpop.f32.mrf.mxu3 }
 0x28e   : > { %v2875_v52 = vpop.f32.mrf.mxu2 }
 0x28f   : > { %v1488_v33 = vpop.f32.mrf.mxu1 }
 0x293   : > { %1372 = vmatmul.bf16.gmra.mxu2 %v2191_v56  ;;  %1421 = vmatmul.bf16.gmra.mxu3 %v2067_v57  ;;  %v2148_v56 = vld [vmem:[%s2623_s8 + $0x158] sm:$0xf0] }
 0x294   : > { %v2839_v11 = vpop.f32.mrf.mxu3  ;;  %v2151_v57 = vor.u32 %v2316_v53, %v2148_v56 }
 0x297   : > { %v1491_v8 = vpop.f32.mrf.mxu1 }
 0x29b   : > { %1525 = vmatmul.bf16.gmra.mxu1 %v2119_v27 }
 0x29c   : > { %v2843_v49 = vpop.f32.mrf.mxu3 }
 0x29f   : > { %v1493_v45 = vpop.f32.mrf.mxu1 }
 0x2a3   : > { %1377 = vmatmul.bf16.gmra.mxu2 %v2207_v61  ;;  %1426 = vmatmul.bf16.gmra.mxu3 %v2083_v2 }
 0x2ab   : > { %1530 = vmatmul.bf16.gmra.mxu1 %v2135_v0  ;;  %v2318_v0 = vld [vmem:[%s2623_s8 + $0x154] sm:$0xf0] }
 0x2ac   : > { %v2147_v53 = vor.u32 %v2318_v0, %v2146_v18 }
 0x2b3   : > { %1382 = vmatmul.bf16.gmra.mxu2 %v2223_v43  ;;  %1431 = vmatmul.bf16.gmra.mxu3 %v2099_v23 }
 0x2b8   : > { %v1496_v54 = vpop.f32.mrf.mxu1 }
 0x2bb   : > { %1535 = vmatmul.bf16.gmra.mxu1 %v2151_v57  ;;  %v2324_v57 = vld [vmem:[%s2623_s8 + $0x18c] sm:$0xf] }
 0x2c0   : > { %v1498_v5 = vpop.f32.mrf.mxu1 }
 0x2c3   : > { %1436 = vmatmul.bf16.gmra.mxu3 %v2115_v50 }
 0x2c6   : > { %v1397_v63 = vpop.f32.mrf.mxu3 }
 0x2c7   : > { %v1398_v4 = vadd.f32 %v1397_v63, %v2745_v32  ;;  %v2314_v32 = vld [vmem:[%s2623_s8 + $0x134] sm:$0xf0] }
 0x2c8   : > { %v2131_v22 = vor.u32 %v2314_v32, %v2130_v16  ;;  %v1501_v27 = vpop.f32.mrf.mxu1 }
 0x2c9   : > { %v1487_v13 = vadd.f32 %v1486_v26, %v1398_v4  ;;  %v2320_v26 = vld [vmem:[%s2623_s8 + $0x16c] sm:$0xf] }
 0x2ca   : > { %v2167_v39 = vor.u32 %v2320_v26, %v2164_v34 }
 0x2cb   : > { %v1669_v7 = vadd.f32 %v2852_v6, %v1487_v13 }
 0x2cc   : > { %1540 = vmatmul.bf16.gmra.mxu1 %v2167_v39 }
 0x2cd   : > { %1701 = vst [vmem:[%s2857_s20] sm:$0xff] %v1669_v7 }
 0x2ce   : > { %v1399_v61 = vpop.f32.mrf.mxu3 }
 0x2cf   : > { %v1400_v2 = vadd.f32 %v1399_v61, %v2751_v48  ;;  %v2162_v61 = vld [vmem:[%s2623_s8 + $0x168] sm:$0xf] }
 0x2d1   : > { %v1489_v24 = vadd.f32 %v1488_v33, %v1400_v2  ;;  %v1503_v33 = vpop.f32.mrf.mxu1  ;;  %v2322_v2 = vld [vmem:[%s2623_s8 + $0x174] sm:$0xf0] }
 0x2d2   : > { %v2163_v26 = vor.u32 %v2322_v2, %v2162_v61  ;;  %v2194_v2 = vld [vmem:[%s2623_s8 + $0x1a8] sm:$0xf] }
 0x2d3   : > { %v1670_v38 = vadd.f32 %v2852_v6, %v1489_v24  ;;  %1441 = vmatmul.bf16.gmra.mxu3 %v2131_v22 }
 0x2d5   : > { %1702 = vst [vmem:[%s2857_s20 + $0x8] sm:$0xff] %v1670_v38  ;;  %v2328_v38 = vld [vmem:[%s2623_s8 + $0x1ac] sm:$0xf] }
 0x2d6   : > { %v1402_v43 = vpop.f32.mrf.mxu3 }
 0x2d7   : > { %v1403_v48 = vadd.f32 %v1402_v43, %v2757_v59  ;;  %v2196_v43 = vld [vmem:[%s2623_s8 + $0x1b8] sm:$0xf0] }
 0x2d9   : > { %v1492_v23 = vadd.f32 %v1491_v8, %v1403_v48  ;;  %v1506_v59 = vpop.f32.mrf.mxu1  ;;  %v2180_v8 = vld [vmem:[%s2623_s8 + $0x198] sm:$0xf0]  ;;  %v2199_v48 = vor.u32 %v2328_v38, %v2196_v43 }
 0x2da   : > { %v2183_v4 = vor.u32 %v2324_v57, %v2180_v8 }
 0x2db   : > { %v1671_v30 = vadd.f32 %v2852_v6, %v1492_v23 }
 0x2dc   : > { %1545 = vmatmul.bf16.gmra.mxu1 %v2183_v4 }
 0x2dd   : > { %1703 = vst [vmem:[%s2857_s20 + $0x10] sm:$0xff] %v1671_v30 }
 0x2de   : > { %v1404_v58 = vpop.f32.mrf.mxu3 }
 0x2df   : > { %v1405_v50 = vadd.f32 %v1404_v58, %v2765_v12  ;;  %v1333_v12 = vpop.f32.mrf.mxu2  ;;  %v2178_v58 = vld [vmem:[%s2623_s8 + $0x188] sm:$0xf] }
 0x2e1   : > { %v1494_v56 = vadd.f32 %v1493_v45, %v1405_v50  ;;  %v1508_v32 = vpop.f32.mrf.mxu1  ;;  %v2326_v50 = vld [vmem:[%s2623_s8 + $0x194] sm:$0xf0] }
 0x2e2   : > { %v2179_v57 = vor.u32 %v2326_v50, %v2178_v58  ;;  %v2210_v50 = vld [vmem:[%s2623_s8 + $0x1c8] sm:$0xf] }
 0x2e3   : > { %v1672_v63 = vadd.f32 %v2852_v6, %v1494_v56  ;;  %1446 = vmatmul.bf16.gmra.mxu3 %v2147_v53 }
 0x2e5   : > { %1704 = vst [vmem:[%s2857_s20 + $0x18] sm:$0xff] %v1672_v63  ;;  %v2332_v63 = vld [vmem:[%s2623_s8 + $0x1cc] sm:$0xf] }
 0x2e6   : > { %v1407_v13 = vpop.f32.mrf.mxu3 }
 0x2e7   : > { %v1408_v7 = vadd.f32 %v1407_v13, %v2773_v17  ;;  %v1335_v39 = vpop.f32.mrf.mxu2  ;;  %v2212_v13 = vld [vmem:[%s2623_s8 + $0x1d8] sm:$0xf0] }
 0x2e9   : > { %v1497_v16 = vadd.f32 %v1496_v54, %v1408_v7  ;;  %v1511_v17 = vpop.f32.mrf.mxu1  ;;  %v1329_v7 = vadd.f32 %v2867_v35, %v2768_v15 }
 0x2eb   : > { %v1673_v45 = vadd.f32 %v2852_v6, %v1497_v16 }
 0x2ec   : > { %1550 = vmatmul.bf16.gmra.mxu1 %v2199_v48  ;;  %v2228_v48 = vld [vmem:[%s2623_s8 + $0x1f8] sm:$0xf0] }
 0x2ed   : > { %1705 = vst [vmem:[%s2857_s20 + $0x20] sm:$0xff] %v1673_v45 }
 0x2ee   : > { %v1409_v22 = vpop.f32.mrf.mxu3 }
 0x2ef   : > { %v1410_v24 = vadd.f32 %v1409_v22, %v2783_v29  ;;  %v1338_v0 = vpop.f32.mrf.mxu2  ;;  %v2330_v22 = vld [vmem:[%s2623_s8 + $0x1b4] sm:$0xf0] }
 0x2f0   : > { %v2195_v35 = vor.u32 %v2330_v22, %v2194_v2 }
 0x2f1   : > { %v1499_v34 = vadd.f32 %v1498_v5, %v1410_v24  ;;  %v1513_v5 = vpop.f32.mrf.mxu1 }
 0x2f3   : > { %v1674_v54 = vadd.f32 %v2852_v6, %v1499_v34  ;;  %1451 = vmatmul.bf16.gmra.mxu3 %v2163_v26  ;;  %v1331_v26 = vadd.f32 %v2875_v52, %v2775_v19 }
 0x2f5   : > { %1706 = vst [vmem:[%s2857_s20 + $0x28] sm:$0xff] %v1674_v54  ;;  %v2336_v54 = vld [vmem:[%s2623_s8 + $0x1ec] sm:$0xf] }
 0x2f6   : > { %v1412_v23 = vpop.f32.mrf.mxu3 }
 0x2f7   : > { %v1413_v29 = vadd.f32 %v1412_v23, %v2789_v40  ;;  %v1340_v16 = vpop.f32.mrf.mxu2  ;;  %v2231_v23 = vor.u32 %v2336_v54, %v2228_v48 }
 0x2f9   : > { %v1502_v30 = vadd.f32 %v1501_v27, %v1413_v29  ;;  %v1516_v4 = vpop.f32.mrf.mxu1  ;;  %v2215_v27 = vor.u32 %v2332_v63, %v2212_v13  ;;  %v1334_v29 = vadd.f32 %v1333_v12, %v2786_v37 }
 0x2fb   : > { %v1675_v18 = vadd.f32 %v2852_v6, %v1502_v30 }
 0x2fc   : > { %1555 = vmatmul.bf16.gmra.mxu1 %v2215_v27 }
 0x2fd   : > { %1707 = vst [vmem:[%s2857_s20 + $0x30] sm:$0xff] %v1675_v18 }
 0x2fe   : > { %v1414_v53 = vpop.f32.mrf.mxu3 }
 0x2ff   : > { %v1415_v56 = vadd.f32 %v1414_v53, %v2799_v20  ;;  %v1343_v38 = vpop.f32.mrf.mxu2  ;;  %v2334_v53 = vld [vmem:[%s2623_s8 + $0x1d4] sm:$0xf0] }
 0x300   : > { %v2211_v37 = vor.u32 %v2334_v53, %v2210_v50 }
 0x301   : > { %v1504_v8 = vadd.f32 %v1503_v33, %v1415_v56  ;;  %v1518_v24 = vpop.f32.mrf.mxu1  ;;  %v1336_v56 = vadd.f32 %v1335_v39, %v2793_v42 }
 0x303   : > { %v1676_v40 = vadd.f32 %v2852_v6, %v1504_v8  ;;  %1456 = vmatmul.bf16.gmra.mxu3 %v2179_v57 }
 0x305   : > { %1708 = vst [vmem:[%s2857_s20 + $0x38] sm:$0xff] %v1676_v40  ;;  %v1339_v40 = vadd.f32 %v1338_v0, %v2804_v47 }
 0x306   : > { %v1417_v20 = vpop.f32.mrf.mxu3 }
 0x307   : > { %v1418_v45 = vadd.f32 %v1417_v20, %v1329_v7  ;;  %v1345_v58 = vpop.f32.mrf.mxu2 }
 0x309   : > { %v1507_v33 = vadd.f32 %v1506_v59, %v1418_v45  ;;  %v1521_v52 = vpop.f32.mrf.mxu1  ;;  %v2226_v45 = vld [vmem:[%s2623_s8 + $0x1e8] sm:$0xf] }
 0x30b   : > { %v1677_v61 = vadd.f32 %v2852_v6, %v1507_v33  ;;  %v2338_v33 = vld [vmem:[%s2623_s8 + $0x1f4] sm:$0xf0] }
 0x30c   : > { %1560 = vmatmul.bf16.gmra.mxu1 %v2231_v23 }
 0x30d   : > { %1709 = vst [vmem:[%s2857_s20 + $0x40] sm:$0xff] %v1677_v61  ;;  %v1341_v61 = vadd.f32 %v1340_v16, %v2807_v60  ;;  %v1346_v16 = vadd.f32 %v1345_v58, %v2821_v10 }
 0x30e   : > { %v1419_v34 = vpop.f32.mrf.mxu3 }
 0x30f   : > { %v1420_v15 = vadd.f32 %v1419_v34, %v1331_v26  ;;  %v2227_v26 = vor.u32 %v2338_v33, %v2226_v45 }
 0x311   : > { %v1509_v43 = vadd.f32 %v1508_v32, %v1420_v15  ;;  %v1523_v12 = vpop.f32.mrf.mxu1 }
 0x313   : > { %v1678_v59 = vadd.f32 %v2852_v6, %v1509_v43  ;;  %1461 = vmatmul.bf16.gmra.mxu3 %v2195_v35 }
 0x315   : > { %1710 = vst [vmem:[%s2857_s20 + $0x48] sm:$0xff] %v1678_v59 }
 0x316   : > { %v1422_v19 = vpop.f32.mrf.mxu3 }
 0x317   : > { %v1423_v30 = vadd.f32 %v1422_v19, %v1334_v29 }
 0x319   : > { %v1512_v18 = vadd.f32 %v1511_v17, %v1423_v30  ;;  %v1348_v17 = vpop.f32.mrf.mxu2  ;;  %v1526_v42 = vpop.f32.mrf.mxu1 }
 0x31b   : > { %v1679_v32 = vadd.f32 %v2852_v6, %v1512_v18 }
 0x31d   : > { %1711 = vst [vmem:[%s2857_s20 + $0x50] sm:$0xff] %v1679_v32 }
 0x31e   : > { %v1424_v57 = vpop.f32.mrf.mxu3 }
 0x31f   : > { %v1425_v8 = vadd.f32 %v1424_v57, %v1336_v56 }
 0x321   : > { %v1514_v63 = vadd.f32 %v1513_v5, %v1425_v8  ;;  %v1350_v5 = vpop.f32.mrf.mxu2  ;;  %v1528_v0 = vpop.f32.mrf.mxu1 }
 0x322   : > { %v1351_v58 = vadd.f32 %v1350_v5, %v2720_v36 }
 0x323   : > { %v1680_v13 = vadd.f32 %v2852_v6, %v1514_v63  ;;  %1466 = vmatmul.bf16.gmra.mxu3 %v2211_v37 }
 0x325   : > { %1712 = vst [vmem:[%s2857_s20 + $0x58] sm:$0xff] %v1680_v13 }
 0x326   : > { %v1427_v27 = vpop.f32.mrf.mxu3 }
 0x327   : > { %v1428_v7 = vadd.f32 %v1427_v27, %v1339_v40 }
 0x329   : > { %v1517_v20 = vadd.f32 %v1516_v4, %v1428_v7  ;;  %v1344_v4 = vadd.f32 %v1343_v38, %v2816_v3  ;;  %v1353_v43 = vpop.f32.mrf.mxu2  ;;  %v1349_v3 = vadd.f32 %v1348_v17, %v2714_v25 }
 0x32a   : > { %v1354_v25 = vadd.f32 %v1353_v43, %v2736_v44 }
 0x32b   : > { %v1681_v39 = vadd.f32 %v2852_v6, %v1517_v20 }
 0x32d   : > { %1713 = vst [vmem:[%s2857_s20 + $0x60] sm:$0xff] %v1681_v39 }
 0x32e   : > { %v1429_v2 = vpop.f32.mrf.mxu3 }
 0x32f   : > { %v1430_v22 = vadd.f32 %v1429_v2, %v1341_v61 }
 0x331   : > { %v1519_v34 = vadd.f32 %v1518_v24, %v1430_v22  ;;  %v1531_v24 = vpop.f32.mrf.mxu1  ;;  %v1355_v29 = vpop.f32.mrf.mxu2 }
 0x332   : > { %v1356_v36 = vadd.f32 %v1355_v29, %v2743_v14 }
 0x333   : > { %v1682_v47 = vadd.f32 %v2852_v6, %v1519_v34  ;;  %1471 = vmatmul.bf16.gmra.mxu3 %v2227_v26 }
 0x335   : > { %1714 = vst [vmem:[%s2857_s20 + $0x68] sm:$0xff] %v1682_v47 }
 0x336   : > { %v1432_v15 = vpop.f32.mrf.mxu3 }
 0x337   : > { %v1433_v35 = vadd.f32 %v1432_v15, %v1344_v4 }
 0x339   : > { %v1522_v54 = vadd.f32 %v1521_v52, %v1433_v35  ;;  %v1533_v52 = vpop.f32.mrf.mxu1  ;;  %v1358_v10 = vpop.f32.mrf.mxu2 }
 0x33a   : > { %v1359_v44 = vadd.f32 %v1358_v10, %v2753_v51 }
 0x33b   : > { %v1683_v60 = vadd.f32 %v2852_v6, %v1522_v54 }
 0x33d   : > { %1715 = vst [vmem:[%s2857_s20 + $0x70] sm:$0xff] %v1683_v60 }
 0x33e   : > { %v1434_v48 = vpop.f32.mrf.mxu3 }
 0x33f   : > { %v1435_v59 = vadd.f32 %v1434_v48, %v1346_v16 }
 0x341   : > { %v1524_v23 = vadd.f32 %v1523_v12, %v1435_v59  ;;  %v1536_v57 = vpop.f32.mrf.mxu1  ;;  %v1360_v37 = vpop.f32.mrf.mxu2 }
 0x342   : > { %v1361_v14 = vadd.f32 %v1360_v37, %v2759_v62 }
 0x343   : > { %v1684_v19 = vadd.f32 %v2852_v6, %v1524_v23 }
 0x345   : > { %1716 = vst [vmem:[%s2857_s20 + $0x78] sm:$0xff] %v1684_v19 }
 0x346   : > { %v1437_v38 = vpop.f32.mrf.mxu3 }
 0x347   : > { %v1438_v30 = vadd.f32 %v1437_v38, %v1349_v3 }
 0x349   : > { %v1527_v18 = vadd.f32 %v1526_v42, %v1438_v30  ;;  %v1538_v40 = vpop.f32.mrf.mxu1  ;;  %v1363_v20 = vpop.f32.mrf.mxu2 }
 0x34a   : > { %v1364_v15 = vadd.f32 %v1363_v20, %v2771_v1 }
 0x34b   : > { %v1685_v32 = vadd.f32 %v2852_v6, %v1527_v18 }
 0x34d   : > { %1717 = vst [vmem:[%s2857_s20 + $0x80] sm:$0xff] %v1685_v32 }
 0x34e   : > { %v1439_v50 = vpop.f32.mrf.mxu3 }
 0x34f   : > { %v1440_v53 = vadd.f32 %v1439_v50, %v1351_v58 }
 0x351   : > { %v1529_v56 = vadd.f32 %v1528_v0, %v1440_v53  ;;  %v1541_v33 = vpop.f32.mrf.mxu1  ;;  %v1365_v2 = vpop.f32.mrf.mxu2 }
 0x352   : > { %v1366_v62 = vadd.f32 %v1365_v2, %v2781_v28 }
 0x353   : > { %v1686_v8 = vadd.f32 %v2852_v6, %v1529_v56 }
 0x355   : > { %1718 = vst [vmem:[%s2857_s20 + $0x88] sm:$0xff] %v1686_v8 }
 0x356   : > { %v1442_v12 = vpop.f32.mrf.mxu3 }
 0x357   : > { %v1443_v63 = vadd.f32 %v1442_v12, %v1354_v25 }
 0x359   : > { %v1532_v13 = vadd.f32 %v1531_v24, %v1443_v63  ;;  %v1543_v47 = vpop.f32.mrf.mxu1  ;;  %v1368_v51 = vpop.f32.mrf.mxu2 }
 0x35a   : > { %v1369_v1 = vadd.f32 %v1368_v51, %v2791_v41 }
 0x35b   : > { %v1687_v17 = vadd.f32 %v2852_v6, %v1532_v13 }
 0x35d   : > { %1719 = vst [vmem:[%s2857_s20 + $0x90] sm:$0xff] %v1687_v17 }
 0x35e   : > { %v1444_v27 = vpop.f32.mrf.mxu3 }
 0x35f   : > { %v1445_v7 = vadd.f32 %v1444_v27, %v1356_v36 }
 0x361   : > { %v1534_v42 = vadd.f32 %v1533_v52, %v1445_v7  ;;  %v1546_v60 = vpop.f32.mrf.mxu1  ;;  %v1370_v48 = vpop.f32.mrf.mxu2 }
 0x362   : > { %v1371_v28 = vadd.f32 %v1370_v48, %v2802_v46 }
 0x363   : > { %v1688_v39 = vadd.f32 %v2852_v6, %v1534_v42 }
 0x365   : > { %1720 = vst [vmem:[%s2857_s20 + $0x98] sm:$0xff] %v1688_v39 }
 0x366   : > { %v1447_v45 = vpop.f32.mrf.mxu3 }
 0x367   : > { %v1448_v61 = vadd.f32 %v1447_v45, %v1359_v44 }
 0x369   : > { %v1537_v5 = vadd.f32 %v1536_v57, %v1448_v61  ;;  %v1548_v19 = vpop.f32.mrf.mxu1  ;;  %v1373_v30 = vpop.f32.mrf.mxu2 }
 0x36a   : > { %v1374_v41 = vadd.f32 %v1373_v30, %v2813_v55 }
 0x36b   : > { %v1689_v22 = vadd.f32 %v2852_v6, %v1537_v5 }
 0x36d   : > { %1721 = vst [vmem:[%s2857_s20 + $0xa0] sm:$0xff] %v1689_v22 }
 0x36e   : > { %v1449_v26 = vpop.f32.mrf.mxu3 }
 0x36f   : > { %v1450_v34 = vadd.f32 %v1449_v26, %v1361_v14 }
 0x371   : > { %v1539_v0 = vadd.f32 %v1538_v40, %v1450_v34  ;;  %v1551_v10 = vpop.f32.mrf.mxu1  ;;  %v1375_v53 = vpop.f32.mrf.mxu2 }
 0x372   : > { %v1376_v63 = vadd.f32 %v1375_v53, %v2819_v9 }
 0x373   : > { %v1690_v4 = vadd.f32 %v2852_v6, %v1539_v0 }
 0x375   : > { %1722 = vst [vmem:[%s2857_s20 + $0xa8] sm:$0xff] %v1690_v4 }
 0x376   : > { %v1452_v35 = vpop.f32.mrf.mxu3 }
 0x377   : > { %v1453_v43 = vadd.f32 %v1452_v35, %v1364_v15 }
 0x379   : > { %v1542_v54 = vadd.f32 %v1541_v33, %v1453_v43  ;;  %v1553_v25 = vpop.f32.mrf.mxu1  ;;  %v1378_v46 = vpop.f32.mrf.mxu2 }
 0x37a   : > { %v1379_v55 = vadd.f32 %v1378_v46, %v2827_v21 }
 0x37b   : > { %v1691_v16 = vadd.f32 %v2852_v6, %v1542_v54 }
 0x37d   : > { %1723 = vst [vmem:[%s2857_s20 + $0xb0] sm:$0xff] %v1691_v16 }
 0x37e   : > { %v1454_v24 = vpop.f32.mrf.mxu3 }
 0x37f   : > { %v1455_v59 = vadd.f32 %v1454_v24, %v1366_v62 }
 0x381   : > { %v1544_v23 = vadd.f32 %v1543_v47, %v1455_v59  ;;  %v1556_v36 = vpop.f32.mrf.mxu1  ;;  %v1380_v7 = vpop.f32.mrf.mxu2 }
 0x382   : > { %v1381_v9 = vadd.f32 %v1380_v7, %v2831_v31 }
 0x383   : > { %v1692_v29 = vadd.f32 %v2852_v6, %v1544_v23 }
 0x385   : > { %1724 = vst [vmem:[%s2857_s20 + $0xb8] sm:$0xff] %v1692_v29 }
 0x386   : > { %v1457_v3 = vpop.f32.mrf.mxu3 }
 0x387   : > { %v1458_v38 = vadd.f32 %v1457_v3, %v1369_v1 }
 0x389   : > { %v1547_v52 = vadd.f32 %v1546_v60, %v1458_v38  ;;  %v1558_v45 = vpop.f32.mrf.mxu1  ;;  %v1383_v5 = vpop.f32.mrf.mxu2 }
 0x38a   : > { %v1384_v21 = vadd.f32 %v1383_v5, %v2839_v11 }
 0x38b   : > { %v1693_v18 = vadd.f32 %v2852_v6, %v1547_v52 }
 0x38d   : > { %1725 = vst [vmem:[%s2857_s20 + $0xc0] sm:$0xff] %v1693_v18 }
 0x38e   : > { %v1459_v32 = vpop.f32.mrf.mxu3 }
 0x38f   : > { %v1460_v58 = vadd.f32 %v1459_v32, %v1371_v28 }
 0x391   : > { %v1549_v50 = vadd.f32 %v1548_v19, %v1460_v58  ;;  %v1561_v26 = vpop.f32.mrf.mxu1  ;;  %v1385_v0 = vpop.f32.mrf.mxu2 }
 0x392   : > { %v1386_v31 = vadd.f32 %v1385_v0, %v2843_v49 }
 0x393   : > { %v1694_v56 = vadd.f32 %v2852_v6, %v1549_v50 }
 0x395   : > { %1726 = vst [vmem:[%s2857_s20 + $0xc8] sm:$0xff] %v1694_v56 }
 0x396   : > { %v1462_v57 = vpop.f32.mrf.mxu3 }
 0x397   : > { %v1463_v8 = vadd.f32 %v1462_v57, %v1374_v41 }
 0x399   : > { %v1552_v37 = vadd.f32 %v1551_v10, %v1463_v8  ;;  %v1563_v35 = vpop.f32.mrf.mxu1 }
 0x39b   : > { %v1695_v12 = vadd.f32 %v2852_v6, %v1552_v37 }
 0x39d   : > { %1727 = vst [vmem:[%s2857_s20 + $0xd0] sm:$0xff] %v1695_v12 }
 0x39e   : > { %v1464_v13 = vpop.f32.mrf.mxu3 }
 0x39f   : > { %v1465_v17 = vadd.f32 %v1464_v13, %v1376_v63 }
 0x3a1   : > { %v1554_v40 = vadd.f32 %v1553_v25, %v1465_v17 }
 0x3a3   : > { %v1696_v27 = vadd.f32 %v2852_v6, %v1554_v40 }
 0x3a5   : > { %1728 = vst [vmem:[%s2857_s20 + $0xd8] sm:$0xff] %v1696_v27 }
 0x3a6   : > { %v1467_v20 = vpop.f32.mrf.mxu3 }
 0x3a7   : > { %v1468_v42 = vadd.f32 %v1467_v20, %v1379_v55 }
 0x3a9   : > { %v1557_v39 = vadd.f32 %v1556_v36, %v1468_v42 }
 0x3ab   : > { %v1697_v44 = vadd.f32 %v2852_v6, %v1557_v39 }
 0x3ad   : > { %1729 = vst [vmem:[%s2857_s20 + $0xe0] sm:$0xff] %v1697_v44 }
 0x3ae   : > { %v1469_v33 = vpop.f32.mrf.mxu3 }
 0x3af   : > { %v1470_v61 = vadd.f32 %v1469_v33, %v1381_v9 }
 0x3b1   : > { %v1559_v2 = vadd.f32 %v1558_v45, %v1470_v61 }
 0x3b3   : > { %v1698_v22 = vadd.f32 %v2852_v6, %v1559_v2 }
 0x3b5   : > { %1730 = vst [vmem:[%s2857_s20 + $0xe8] sm:$0xff] %v1698_v22 }
 0x3b6   : > { %v1472_v14 = vpop.f32.mrf.mxu3 }
 0x3b7   : > { %v1473_v34 = vadd.f32 %v1472_v14, %v1384_v21 }
 0x3b9   : > { %v1562_v47 = vadd.f32 %v1561_v26, %v1473_v34 }
 0x3bb   : > { %v1699_v4 = vadd.f32 %v2852_v6, %v1562_v47 }
 0x3bd   : > { %1731 = vst [vmem:[%s2857_s20 + $0xf0] sm:$0xff] %v1699_v4 }
 0x3be   : > { %v1474_v51 = vpop.f32.mrf.mxu3 }
 0x3bf   : > { %v1475_v15 = vadd.f32 %v1474_v51, %v1386_v31 }
 0x3c1   : > { %v1564_v43 = vadd.f32 %v1563_v35, %v1475_v15 }
 0x3c3   : > { %v1700_v54 = vadd.f32 %v2852_v6, %v1564_v43 }
 0x3c5   : > { %1732 = vst [vmem:[%s2857_s20 + $0xf8] sm:$0xff] %v1700_v54 }
 0x3c6 PF: > { %s14_s17 = sadd.s32 1, %s2402_s17   ;;  %s2998_s15 = smov %s2398_s16 }
 0x3c7   : > { %p11_p5 = scmp.ge.s32.totalorder %s14_s17, 4   ;;  %s2999_s16 = smov %s3001_s18 }
 0x3c9   :  { %13 = sbr.rel (!%p11_p5) target bundleno = 2 (0x2), region = 75 }

</bundles_post_ra>
